<compile_context>
chip_gen: v7x
topology: tpu7x:2x2x1
jax: 0.10.0
libtpu: 0.0.40
codegen_flags: <defaults>
</compile_context>

<pallas_src>
import functools

import jax
import jax.numpy as jnp
from jax.experimental import pallas as pl
from jax.experimental.pallas import tpu as pltpu


def _round_up(x, m):
    return (x + m - 1) // m * m


# ----------------------------------------------------------------------------
# Fused MVAE forward kernel (one batch tile per grid step)
# ----------------------------------------------------------------------------
def mvae_kernel(hidden, zp,
                x1_ref, x2_ref, eps_ref,
                e1w1, e1b1, e1w2, e1b2,
                e2w1, e2b1, e2w2, e2b2,
                dw1, db1, d1w2, d1b2, d2w2, d2b2,
                mux1_ref, mux2_ref, m_ref, c_ref):
    f32 = jnp.float32
    bf16 = jnp.bfloat16

    def encode(x, w1, b1, w2, b2):
        # bf16 operands -> MXU native, f32 accumulation.
        h = jnp.dot(x.astype(bf16), w1[...], preferred_element_type=f32) + b1[...]
        h = jnp.maximum(h, 0.0).astype(bf16)
        # Fused mu/logvar head: one (hidden, 2*zp) matmul, lane-aligned split.
        head = jnp.dot(h, w2[...], preferred_element_type=f32) + b2[...]
        mu = head[:, :zp]
        logvar = head[:, zp:]
        return mu, jnp.exp(logvar)

    mu1, var1 = encode(x1_ref[...], e1w1, e1b1, e1w2, e1b2)
    mu2, var2 = encode(x2_ref[...], e2w1, e2b1, e2w2, e2b2)

    # Product-of-experts fusion exactly as written in the reference forward.
    # Exact f32 divides / sqrt (EUP) to stay close to the PyTorch reference.
    prec = 1.0 / var1 + 1.0 / var2
    C = 1.0 / prec
    m = C * (var1 * mu1 + var2 * mu2)
    z = eps_ref[...] * jnp.sqrt(C) + m

    # Fused decoder first layers: z @ [d1w1 | d2w1]  -> (tile_n, 2*hidden).
    h12 = jnp.dot(z.astype(bf16), dw1[...], preferred_element_type=f32) + db1[...]
    h12 = jnp.maximum(h12, 0.0).astype(bf16)
    h1 = h12[:, :hidden]          # lane-aligned split (hidden is a multiple of 128)
    h2 = h12[:, hidden:]

    mux1_ref[...] = jnp.dot(h1, d1w2[...], preferred_element_type=f32) + d1b2[...]
    mux2_ref[...] = jnp.dot(h2, d2w2[...], preferred_element_type=f32) + d2b2[...]
    m_ref[...] = m
    c_ref[...] = C


# ----------------------------------------------------------------------------
# Wrapper: VMEM-budgeted batch tiling, lane padding, pallas_call
# ----------------------------------------------------------------------------
def mvae_forward(x_1, x_2, eps, params, dimz, hidden, zp):
    """x_1, x_2: NCHW float32 images. eps: (N, dimz). Returns (mu_x_1, mu_x_2, m, C)."""
    N = x_1.shape[0]
    shape1, shape2 = x_1.shape, x_2.shape
    D1 = shape1[1] * shape1[2] * shape1[3]
    D2 = shape2[1] * shape2[2] * shape2[3]

    names = ["e1w1", "e1b1", "e1w2", "e1b2",
             "e2w1", "e2b1", "e2w2", "e2b2",
             "dw1", "db1", "d1w2", "d1b2", "d2w2", "d2b2"]
    weights = [params[n] for n in names]
    weight_bytes = sum(int(w.size) * w.dtype.itemsize for w in weights)

    # ---- VMEM-budget-aware batch tile (generation aware: 64 MiB on v7x) ----
    try:
        vmem_cap = int(pltpu.get_tpu_info().vmem_capacity_bytes)
    except Exception:
        vmem_cap = 64 * 1024 * 1024            # conservative (v7x) fallback
    # Streamed f32 bytes per batch row (inputs + outputs), double-buffered.
    row_bytes = (D1 + D2 + zp) * 4 + (D1 + D2 + 2 * zp) * 4
    budget = int(0.70 * vmem_cap)
    tile_cap = (budget - weight_bytes) // (2 * row_bytes)
    tile_cap = max(8, min(512, (tile_cap // 8) * 8))
    tile_cap = min(tile_cap, _round_up(max(N, 1), 8))

    # Prefer a tile that divides N (avoids a wrapper-side pad = extra HBM pass),
    # but don't sacrifice more than half the VMEM-allowed tile size for it.
    tile_n = None
    t = tile_cap
    while t >= max(8, tile_cap // 2):
        if N % t == 0:
            tile_n = t
            break
        t -= 8
    if tile_n is None:
        tile_n = tile_cap
    n_pad = _round_up(N, tile_n)

    # Small-batch megacore: if the whole batch is one big tile, split it so
    # both v7x TensorCores get work (each half still >=128 rows -> MXU full).
    if n_pad // tile_n == 1 and tile_n >= 256 and tile_n % 16 == 0:
        tile_n //= 2

    grid = (n_pad // tile_n,)

    x1f = x_1.reshape(N, D1)
    x2f = x_2.reshape(N, D2)
    if n_pad != N:
        x1f = jnp.pad(x1f, ((0, n_pad - N), (0, 0)))
        x2f = jnp.pad(x2f, ((0, n_pad - N), (0, 0)))
    # Zero-pad eps in batch and latent; padded latent lanes give z == 0 there
    # and the decoder's padded weight rows are zero, so results are unaffected.
    eps_p = jnp.pad(eps, ((0, n_pad - N), (0, zp - dimz)))

    def tile2(d):
        return pl.BlockSpec((tile_n, d), lambda i: (i, 0))

    # Whole-array VMEM residency, single-buffered (no pipelining/duplication).
    w_specs = [pl.BlockSpec(memory_space=pltpu.MemorySpace.VMEM) for _ in weights]

    out_shapes = (
        jax.ShapeDtypeStruct((n_pad, D1), jnp.float32),   # mu_x_1 (flat)
        jax.ShapeDtypeStruct((n_pad, D2), jnp.float32),   # mu_x_2 (flat)
        jax.ShapeDtypeStruct((n_pad, zp), jnp.float32),   # m  (lane-padded)
        jax.ShapeDtypeStruct((n_pad, zp), jnp.float32),   # C  (lane-padded)
    )

    # Explicit VMEM limit sized from what this config actually needs.
    needed = weight_bytes + 2 * tile_n * row_bytes + (8 << 20)
    vmem_limit = min(max(32 << 20, needed), int(0.9 * vmem_cap))

    mux1, mux2, m, C = pl.pallas_call(
        functools.partial(mvae_kernel, hidden, zp),
        out_shape=out_shapes,
        grid_spec=pltpu.PrefetchScalarGridSpec(
            num_scalar_prefetch=0,
            grid=grid,
            in_specs=[tile2(D1), tile2(D2), tile2(zp)] + w_specs,
            out_specs=(tile2(D1), tile2(D2), tile2(zp), tile2(zp)),
        ),
        compiler_params=pltpu.CompilerParams(
            dimension_semantics=("parallel",),      # megacore shard on v7x
            vmem_limit_bytes=vmem_limit,
        ),
    )(x1f, x2f, eps_p, *weights)

    return (mux1[:N].reshape(shape1), mux2[:N].reshape(shape2),
            m[:N, :dimz], C[:N, :dimz])


# ----------------------------------------------------------------------------
# Deterministic parameter init (synthetic, scaled by 1/sqrt(fan_in))
#   - mu/logvar heads fused per encoder into one lane-padded (hidden, 2*zp) W
#   - decoder first layers concatenated into one (zp, 2*hidden) matrix
#   - matmul weights stored in bf16, biases in f32
# ----------------------------------------------------------------------------
def init_params(key, dimz, D1, D2, hidden, zp):
    keys = jax.random.split(key, 10)

    def lin(k, fan_in, fan_out, scale=1.0):
        return (scale / jnp.sqrt(fan_in)) * jax.random.normal(
            k, (fan_in, fan_out), dtype=jnp.float32)

    def pad_cols(w, total):
        return jnp.pad(w, ((0, 0), (0, total - w.shape[1])))

    def pad_rows(w, total):
        return jnp.pad(w, ((0, total - w.shape[0]), (0, 0)))

    p = {}
    # encoder 1: D1 -> hidden -> fused [mu | logvar] head of width 2*zp
    p["e1w1"] = lin(keys[0], D1, hidden)
    p["e1b1"] = jnp.zeros((1, hidden), jnp.float32)
    p["e1w2"] = jnp.concatenate(
        [pad_cols(lin(keys[1], hidden, dimz, 0.1), zp),
         pad_cols(lin(keys[2], hidden, dimz, 0.1), zp)], axis=1)
    p["e1b2"] = jnp.zeros((1, 2 * zp), jnp.float32)
    # encoder 2
    p["e2w1"] = lin(keys[3], D2, hidden)
    p["e2b1"] = jnp.zeros((1, hidden), jnp.float32)
    p["e2w2"] = jnp.concatenate(
        [pad_cols(lin(keys[4], hidden, dimz, 0.1), zp),
         pad_cols(lin(keys[5], hidden, dimz, 0.1), zp)], axis=1)
    p["e2b2"] = jnp.zeros((1, 2 * zp), jnp.float32)
    # decoders: dimz -> hidden -> D ; first layers fused as [d1w1 | d2w1]
    d1w1 = pad_rows(lin(keys[6], dimz, hidden), zp)
    d2w1 = pad_rows(lin(keys[7], dimz, hidden), zp)
    p["dw1"] = jnp.concatenate([d1w1, d2w1], axis=1)
    p["db1"] = jnp.zeros((1, 2 * hidden), jnp.float32)
    p["d1w2"] = lin(keys[8], hidden, D1)
    p["d1b2"] = jnp.zeros((1, D1), jnp.float32)
    p["d2w2"] = lin(keys[9], hidden, D2)
    p["d2b2"] = jnp.zeros((1, D2), jnp.float32)

    # bf16 matmul operands (MXU-native on v6e/v7x, accepted on v5e); biases f32.
    for name in ["e1w1", "e1w2", "e2w1", "e2w2", "dw1", "d1w2", "d2w2"]:
        p[name] = p[name].astype(jnp.bfloat16)
    return p


if __name__ == "__main__":
    # Small shapes consistent with the module: two image modalities, NCHW.
    N, H, W = 2, 16, 16
    channels = [3, 3]
    dimz = 8
    hidden = 128                                  # MXU-width aligned
    zp = max(128, _round_up(dimz, 128))           # lane-padded latent width
    D1 = channels[0] * H * W
    D2 = channels[1] * H * W

    key = jax.random.PRNGKey(0)
    kx1, kx2, keps, kparams = jax.random.split(key, 4)

    x_1 = jax.random.normal(kx1, (N, channels[0], H, W), dtype=jnp.float32)
    x_2 = jax.random.normal(kx2, (N, channels[1], H, W), dtype=jnp.float32)
    # torch.randn_like(C) replaced by a host-side deterministic draw fed to the kernel.
    eps = jax.random.normal(keps, (N, dimz), dtype=jnp.float32)

    params = init_params(kparams, dimz, D1, D2, hidden, zp)

    mu_x_1, mu_x_2, m, C = mvae_forward(x_1, x_2, eps, params, dimz, hidden, zp)
    jax.block_until_ready((mu_x_1, mu_x_2, m, C))

    assert mu_x_1.shape == x_1.shape and mu_x_2.shape == x_2.shape
    assert m.shape == (N, dimz) and C.shape == (N, dimz)
    assert bool(jnp.all(jnp.isfinite(mu_x_1))) and bool(jnp.all(jnp.isfinite(C)))
    print("KERNEL_OK")
</pallas_src>

<mosaic_0001>
module attributes {stable_mosaic.version = 11 : i64} {
  func.func @mvae_kernel(%arg0: i32, %arg1: memref<8x768xf32, #tpu.memory_space<vmem>>, %arg2: memref<8x768xf32, #tpu.memory_space<vmem>>, %arg3: memref<8x128xf32, #tpu.memory_space<vmem>>, %arg4: memref<768x128xbf16, #tpu.memory_space<vmem>>, %arg5: memref<1x128xf32, #tpu.memory_space<vmem>>, %arg6: memref<128x256xbf16, #tpu.memory_space<vmem>>, %arg7: memref<1x256xf32, #tpu.memory_space<vmem>>, %arg8: memref<768x128xbf16, #tpu.memory_space<vmem>>, %arg9: memref<1x128xf32, #tpu.memory_space<vmem>>, %arg10: memref<128x256xbf16, #tpu.memory_space<vmem>>, %arg11: memref<1x256xf32, #tpu.memory_space<vmem>>, %arg12: memref<128x256xbf16, #tpu.memory_space<vmem>>, %arg13: memref<1x256xf32, #tpu.memory_space<vmem>>, %arg14: memref<128x768xbf16, #tpu.memory_space<vmem>>, %arg15: memref<1x768xf32, #tpu.memory_space<vmem>>, %arg16: memref<128x768xbf16, #tpu.memory_space<vmem>>, %arg17: memref<1x768xf32, #tpu.memory_space<vmem>>, %arg18: memref<8x768xf32, #tpu.memory_space<vmem>>, %arg19: memref<8x768xf32, #tpu.memory_space<vmem>>, %arg20: memref<8x128xf32, #tpu.memory_space<vmem>>, %arg21: memref<8x128xf32, #tpu.memory_space<vmem>>) attributes {dimension_semantics = [#tpu.dimension_semantics<parallel>], iteration_bounds = array<i64: 1>, scalar_prefetch = 0 : i64, scratch_operands = 0 : i64, tpu.core_type = #tpu.core_type<tc>, window_params = [{transform_indices = @transform_0, window_bounds = array<i64: 8, 768>}, {transform_indices = @transform_1, window_bounds = array<i64: 8, 768>}, {transform_indices = @transform_2, window_bounds = array<i64: 8, 128>}, {pipeline_mode = #tpu.pipeline_mode<synchronous>, transform_indices = @transform_3, window_bounds = array<i64: 768, 128>}, {pipeline_mode = #tpu.pipeline_mode<synchronous>, transform_indices = @transform_4, window_bounds = array<i64: 1, 128>}, {pipeline_mode = #tpu.pipeline_mode<synchronous>, transform_indices = @transform_5, window_bounds = array<i64: 128, 256>}, {pipeline_mode = #tpu.pipeline_mode<synchronous>, transform_indices = @transform_6, window_bounds = array<i64: 1, 256>}, {pipeline_mode = #tpu.pipeline_mode<synchronous>, transform_indices = @transform_7, window_bounds = array<i64: 768, 128>}, {pipeline_mode = #tpu.pipeline_mode<synchronous>, transform_indices = @transform_8, window_bounds = array<i64: 1, 128>}, {pipeline_mode = #tpu.pipeline_mode<synchronous>, transform_indices = @transform_9, window_bounds = array<i64: 128, 256>}, {pipeline_mode = #tpu.pipeline_mode<synchronous>, transform_indices = @transform_10, window_bounds = array<i64: 1, 256>}, {pipeline_mode = #tpu.pipeline_mode<synchronous>, transform_indices = @transform_11, window_bounds = array<i64: 128, 256>}, {pipeline_mode = #tpu.pipeline_mode<synchronous>, transform_indices = @transform_12, window_bounds = array<i64: 1, 256>}, {pipeline_mode = #tpu.pipeline_mode<synchronous>, transform_indices = @transform_13, window_bounds = array<i64: 128, 768>}, {pipeline_mode = #tpu.pipeline_mode<synchronous>, transform_indices = @transform_14, window_bounds = array<i64: 1, 768>}, {pipeline_mode = #tpu.pipeline_mode<synchronous>, transform_indices = @transform_15, window_bounds = array<i64: 128, 768>}, {pipeline_mode = #tpu.pipeline_mode<synchronous>, transform_indices = @transform_16, window_bounds = array<i64: 1, 768>}, {transform_indices = @transform_17, window_bounds = array<i64: 8, 768>}, {transform_indices = @transform_18, window_bounds = array<i64: 8, 768>}, {transform_indices = @transform_19, window_bounds = array<i64: 8, 128>}, {transform_indices = @transform_20, window_bounds = array<i64: 8, 128>}]} {
    %c0 = arith.constant 0 : index
    %c0_0 = arith.constant 0 : index
    %0 = vector.load %arg1[%c0, %c0_0] : memref<8x768xf32, #tpu.memory_space<vmem>>, vector<8x768xf32>
    %1 = arith.truncf %0 : vector<8x768xf32> to vector<8x768xbf16>
    %c0_1 = arith.constant 0 : index
    %c0_2 = arith.constant 0 : index
    %2 = vector.load %arg4[%c0_1, %c0_2] : memref<768x128xbf16, #tpu.memory_space<vmem>>, vector<768x128xbf16>
    %cst = arith.constant dense<0.000000e+00> : vector<8x128xf32>
    %3 = tpu.matmul %1, %2, %cst {dimension_numbers = #tpu.dot_dimension_numbers<[1], [0], [0], [1], [0, 0, 1, 1], [], []>} : vector<8x768xbf16>, vector<768x128xbf16>, vector<8x128xf32> -> vector<8x128xf32>
    %c0_3 = arith.constant 0 : index
    %c0_4 = arith.constant 0 : index
    %4 = vector.load %arg5[%c0_3, %c0_4] : memref<1x128xf32, #tpu.memory_space<vmem>>, vector<1x128xf32>
    %5 = vector.broadcast %4 : vector<1x128xf32> to vector<8x128xf32>
    %6 = arith.addf %3, %5 : vector<8x128xf32>
    %cst_5 = arith.constant 0.000000e+00 : f32
    %7 = vector.broadcast %cst_5 : f32 to vector<8x128xf32>
    %8 = arith.maximumf %6, %7 : vector<8x128xf32>
    %9 = arith.truncf %8 : vector<8x128xf32> to vector<8x128xbf16>
    %c0_6 = arith.constant 0 : index
    %c0_7 = arith.constant 0 : index
    %10 = vector.load %arg6[%c0_6, %c0_7] : memref<128x256xbf16, #tpu.memory_space<vmem>>, vector<128x256xbf16>
    %cst_8 = arith.constant dense<0.000000e+00> : vector<8x256xf32>
    %11 = tpu.matmul %9, %10, %cst_8 {dimension_numbers = #tpu.dot_dimension_numbers<[1], [0], [0], [1], [0, 0, 1, 1], [], []>} : vector<8x128xbf16>, vector<128x256xbf16>, vector<8x256xf32> -> vector<8x256xf32>
    %c0_9 = arith.constant 0 : index
    %c0_10 = arith.constant 0 : index
    %12 = vector.load %arg7[%c0_9, %c0_10] : memref<1x256xf32, #tpu.memory_space<vmem>>, vector<1x256xf32>
    %13 = vector.broadcast %12 : vector<1x256xf32> to vector<8x256xf32>
    %14 = arith.addf %11, %13 : vector<8x256xf32>
    %15 = vector.extract_strided_slice %14 {offsets = [0, 0], sizes = [8, 128], strides = [1, 1]} : vector<8x256xf32> to vector<8x128xf32>
    %16 = vector.extract_strided_slice %14 {offsets = [0, 128], sizes = [8, 128], strides = [1, 1]} : vector<8x256xf32> to vector<8x128xf32>
    %17 = math.exp %16 : vector<8x128xf32>
    %c0_11 = arith.constant 0 : index
    %c0_12 = arith.constant 0 : index
    %18 = vector.load %arg2[%c0_11, %c0_12] : memref<8x768xf32, #tpu.memory_space<vmem>>, vector<8x768xf32>
    %19 = arith.truncf %18 : vector<8x768xf32> to vector<8x768xbf16>
    %c0_13 = arith.constant 0 : index
    %c0_14 = arith.constant 0 : index
    %20 = vector.load %arg8[%c0_13, %c0_14] : memref<768x128xbf16, #tpu.memory_space<vmem>>, vector<768x128xbf16>
    %cst_15 = arith.constant dense<0.000000e+00> : vector<8x128xf32>
    %21 = tpu.matmul %19, %20, %cst_15 {dimension_numbers = #tpu.dot_dimension_numbers<[1], [0], [0], [1], [0, 0, 1, 1], [], []>} : vector<8x768xbf16>, vector<768x128xbf16>, vector<8x128xf32> -> vector<8x128xf32>
    %c0_16 = arith.constant 0 : index
    %c0_17 = arith.constant 0 : index
    %22 = vector.load %arg9[%c0_16, %c0_17] : memref<1x128xf32, #tpu.memory_space<vmem>>, vector<1x128xf32>
    %23 = vector.broadcast %22 : vector<1x128xf32> to vector<8x128xf32>
    %24 = arith.addf %21, %23 : vector<8x128xf32>
    %cst_18 = arith.constant 0.000000e+00 : f32
    %25 = vector.broadcast %cst_18 : f32 to vector<8x128xf32>
    %26 = arith.maximumf %24, %25 : vector<8x128xf32>
    %27 = arith.truncf %26 : vector<8x128xf32> to vector<8x128xbf16>
    %c0_19 = arith.constant 0 : index
    %c0_20 = arith.constant 0 : index
    %28 = vector.load %arg10[%c0_19, %c0_20] : memref<128x256xbf16, #tpu.memory_space<vmem>>, vector<128x256xbf16>
    %cst_21 = arith.constant dense<0.000000e+00> : vector<8x256xf32>
    %29 = tpu.matmul %27, %28, %cst_21 {dimension_numbers = #tpu.dot_dimension_numbers<[1], [0], [0], [1], [0, 0, 1, 1], [], []>} : vector<8x128xbf16>, vector<128x256xbf16>, vector<8x256xf32> -> vector<8x256xf32>
    %c0_22 = arith.constant 0 : index
    %c0_23 = arith.constant 0 : index
    %30 = vector.load %arg11[%c0_22, %c0_23] : memref<1x256xf32, #tpu.memory_space<vmem>>, vector<1x256xf32>
    %31 = vector.broadcast %30 : vector<1x256xf32> to vector<8x256xf32>
    %32 = arith.addf %29, %31 : vector<8x256xf32>
    %33 = vector.extract_strided_slice %32 {offsets = [0, 0], sizes = [8, 128], strides = [1, 1]} : vector<8x256xf32> to vector<8x128xf32>
    %34 = vector.extract_strided_slice %32 {offsets = [0, 128], sizes = [8, 128], strides = [1, 1]} : vector<8x256xf32> to vector<8x128xf32>
    %35 = math.exp %34 : vector<8x128xf32>
    %cst_24 = arith.constant 1.000000e+00 : f32
    %36 = vector.broadcast %cst_24 : f32 to vector<8x128xf32>
    %37 = arith.divf %36, %17 : vector<8x128xf32>
    %cst_25 = arith.constant 1.000000e+00 : f32
    %38 = vector.broadcast %cst_25 : f32 to vector<8x128xf32>
    %39 = arith.divf %38, %35 : vector<8x128xf32>
    %40 = arith.addf %37, %39 : vector<8x128xf32>
    %cst_26 = arith.constant 1.000000e+00 : f32
    %41 = vector.broadcast %cst_26 : f32 to vector<8x128xf32>
    %42 = arith.divf %41, %40 : vector<8x128xf32>
    %43 = arith.mulf %17, %15 : vector<8x128xf32>
    %44 = arith.mulf %35, %33 : vector<8x128xf32>
    %45 = arith.addf %43, %44 : vector<8x128xf32>
    %46 = arith.mulf %42, %45 : vector<8x128xf32>
    %c0_27 = arith.constant 0 : index
    %c0_28 = arith.constant 0 : index
    %47 = vector.load %arg3[%c0_27, %c0_28] : memref<8x128xf32, #tpu.memory_space<vmem>>, vector<8x128xf32>
    %48 = math.sqrt %42 : vector<8x128xf32>
    %49 = arith.mulf %47, %48 : vector<8x128xf32>
    %50 = arith.addf %49, %46 : vector<8x128xf32>
    %51 = arith.truncf %50 : vector<8x128xf32> to vector<8x128xbf16>
    %c0_29 = arith.constant 0 : index
    %c0_30 = arith.constant 0 : index
    %52 = vector.load %arg12[%c0_29, %c0_30] : memref<128x256xbf16, #tpu.memory_space<vmem>>, vector<128x256xbf16>
    %cst_31 = arith.constant dense<0.000000e+00> : vector<8x256xf32>
    %53 = tpu.matmul %51, %52, %cst_31 {dimension_numbers = #tpu.dot_dimension_numbers<[1], [0], [0], [1], [0, 0, 1, 1], [], []>} : vector<8x128xbf16>, vector<128x256xbf16>, vector<8x256xf32> -> vector<8x256xf32>
    %c0_32 = arith.constant 0 : index
    %c0_33 = arith.constant 0 : index
    %54 = vector.load %arg13[%c0_32, %c0_33] : memref<1x256xf32, #tpu.memory_space<vmem>>, vector<1x256xf32>
    %55 = vector.broadcast %54 : vector<1x256xf32> to vector<8x256xf32>
    %56 = arith.addf %53, %55 : vector<8x256xf32>
    %cst_34 = arith.constant 0.000000e+00 : f32
    %57 = vector.broadcast %cst_34 : f32 to vector<8x256xf32>
    %58 = arith.maximumf %56, %57 : vector<8x256xf32>
    %59 = arith.truncf %58 : vector<8x256xf32> to vector<8x256xbf16>
    %60 = vector.extract_strided_slice %59 {offsets = [0, 0], sizes = [8, 128], strides = [1, 1]} : vector<8x256xbf16> to vector<8x128xbf16>
    %61 = vector.extract_strided_slice %59 {offsets = [0, 128], sizes = [8, 128], strides = [1, 1]} : vector<8x256xbf16> to vector<8x128xbf16>
    %c0_35 = arith.constant 0 : index
    %c0_36 = arith.constant 0 : index
    %62 = vector.load %arg14[%c0_35, %c0_36] : memref<128x768xbf16, #tpu.memory_space<vmem>>, vector<128x768xbf16>
    %cst_37 = arith.constant dense<0.000000e+00> : vector<8x768xf32>
    %63 = tpu.matmul %60, %62, %cst_37 {dimension_numbers = #tpu.dot_dimension_numbers<[1], [0], [0], [1], [0, 0, 1, 1], [], []>} : vector<8x128xbf16>, vector<128x768xbf16>, vector<8x768xf32> -> vector<8x768xf32>
    %c0_38 = arith.constant 0 : index
    %c0_39 = arith.constant 0 : index
    %64 = vector.load %arg15[%c0_38, %c0_39] : memref<1x768xf32, #tpu.memory_space<vmem>>, vector<1x768xf32>
    %65 = vector.broadcast %64 : vector<1x768xf32> to vector<8x768xf32>
    %66 = arith.addf %63, %65 : vector<8x768xf32>
    %c0_40 = arith.constant 0 : index
    %c0_41 = arith.constant 0 : index
    %67 = vector.load %arg18[%c0_40, %c0_41] : memref<8x768xf32, #tpu.memory_space<vmem>>, vector<8x768xf32>
    tpu.vector_store %arg18[%c0_40, %c0_41], %66 {strides = array<i32>} : memref<8x768xf32, #tpu.memory_space<vmem>>, vector<8x768xf32>,
    %c0_42 = arith.constant 0 : index
    %c0_43 = arith.constant 0 : index
    %68 = vector.load %arg16[%c0_42, %c0_43] : memref<128x768xbf16, #tpu.memory_space<vmem>>, vector<128x768xbf16>
    %cst_44 = arith.constant dense<0.000000e+00> : vector<8x768xf32>
    %69 = tpu.matmul %61, %68, %cst_44 {dimension_numbers = #tpu.dot_dimension_numbers<[1], [0], [0], [1], [0, 0, 1, 1], [], []>} : vector<8x128xbf16>, vector<128x768xbf16>, vector<8x768xf32> -> vector<8x768xf32>
    %c0_45 = arith.constant 0 : index
    %c0_46 = arith.constant 0 : index
    %70 = vector.load %arg17[%c0_45, %c0_46] : memref<1x768xf32, #tpu.memory_space<vmem>>, vector<1x768xf32>
    %71 = vector.broadcast %70 : vector<1x768xf32> to vector<8x768xf32>
    %72 = arith.addf %69, %71 : vector<8x768xf32>
    %c0_47 = arith.constant 0 : index
    %c0_48 = arith.constant 0 : index
    %73 = vector.load %arg19[%c0_47, %c0_48] : memref<8x768xf32, #tpu.memory_space<vmem>>, vector<8x768xf32>
    tpu.vector_store %arg19[%c0_47, %c0_48], %72 {strides = array<i32>} : memref<8x768xf32, #tpu.memory_space<vmem>>, vector<8x768xf32>,
    %c0_49 = arith.constant 0 : index
    %c0_50 = arith.constant 0 : index
    %74 = vector.load %arg20[%c0_49, %c0_50] : memref<8x128xf32, #tpu.memory_space<vmem>>, vector<8x128xf32>
    tpu.vector_store %arg20[%c0_49, %c0_50], %46 {strides = array<i32>} : memref<8x128xf32, #tpu.memory_space<vmem>>, vector<8x128xf32>,
    %c0_51 = arith.constant 0 : index
    %c0_52 = arith.constant 0 : index
    %75 = vector.load %arg21[%c0_51, %c0_52] : memref<8x128xf32, #tpu.memory_space<vmem>>, vector<8x128xf32>
    tpu.vector_store %arg21[%c0_51, %c0_52], %42 {strides = array<i32>} : memref<8x128xf32, #tpu.memory_space<vmem>>, vector<8x128xf32>,
    return
  }
  func.func @transform_0(%arg0: i32) -> (i32, i32) {
    %c0_i32 = arith.constant 0 : i32
    %c0_i32_0 = arith.constant 0 : i32
    return %arg0, %c0_i32 : i32, i32
  }
  func.func @transform_1(%arg0: i32) -> (i32, i32) {
    %c0_i32 = arith.constant 0 : i32
    %c0_i32_0 = arith.constant 0 : i32
    return %arg0, %c0_i32 : i32, i32
  }
  func.func @transform_2(%arg0: i32) -> (i32, i32) {
    %c0_i32 = arith.constant 0 : i32
    %c0_i32_0 = arith.constant 0 : i32
    return %arg0, %c0_i32 : i32, i32
  }
  func.func @transform_3(%arg0: i32) -> (i32, i32) {
    %c0_i32 = arith.constant 0 : i32
    %c0_i32_0 = arith.constant 0 : i32
    %c0_i32_1 = arith.constant 0 : i32
    return %c0_i32, %c0_i32_0 : i32, i32
  }
  func.func @transform_4(%arg0: i32) -> (i32, i32) {
    %c0_i32 = arith.constant 0 : i32
    %c0_i32_0 = arith.constant 0 : i32
    %c0_i32_1 = arith.constant 0 : i32
    return %c0_i32, %c0_i32_0 : i32, i32
  }
  func.func @transform_5(%arg0: i32) -> (i32, i32) {
    %c0_i32 = arith.constant 0 : i32
    %c0_i32_0 = arith.constant 0 : i32
    %c0_i32_1 = arith.constant 0 : i32
    return %c0_i32, %c0_i32_0 : i32, i32
  }
  func.func @transform_6(%arg0: i32) -> (i32, i32) {
    %c0_i32 = arith.constant 0 : i32
    %c0_i32_0 = arith.constant 0 : i32
    %c0_i32_1 = arith.constant 0 : i32
    return %c0_i32, %c0_i32_0 : i32, i32
  }
  func.func @transform_7(%arg0: i32) -> (i32, i32) {
    %c0_i32 = arith.constant 0 : i32
    %c0_i32_0 = arith.constant 0 : i32
    %c0_i32_1 = arith.constant 0 : i32
    return %c0_i32, %c0_i32_0 : i32, i32
  }
  func.func @transform_8(%arg0: i32) -> (i32, i32) {
    %c0_i32 = arith.constant 0 : i32
    %c0_i32_0 = arith.constant 0 : i32
    %c0_i32_1 = arith.constant 0 : i32
    return %c0_i32, %c0_i32_0 : i32, i32
  }
  func.func @transform_9(%arg0: i32) -> (i32, i32) {
    %c0_i32 = arith.constant 0 : i32
    %c0_i32_0 = arith.constant 0 : i32
    %c0_i32_1 = arith.constant 0 : i32
    return %c0_i32, %c0_i32_0 : i32, i32
  }
  func.func @transform_10(%arg0: i32) -> (i32, i32) {
    %c0_i32 = arith.constant 0 : i32
    %c0_i32_0 = arith.constant 0 : i32
    %c0_i32_1 = arith.constant 0 : i32
    return %c0_i32, %c0_i32_0 : i32, i32
  }
  func.func @transform_11(%arg0: i32) -> (i32, i32) {
    %c0_i32 = arith.constant 0 : i32
    %c0_i32_0 = arith.constant 0 : i32
    %c0_i32_1 = arith.constant 0 : i32
    return %c0_i32, %c0_i32_0 : i32, i32
  }
  func.func @transform_12(%arg0: i32) -> (i32, i32) {
    %c0_i32 = arith.constant 0 : i32
    %c0_i32_0 = arith.constant 0 : i32
    %c0_i32_1 = arith.constant 0 : i32
    return %c0_i32, %c0_i32_0 : i32, i32
  }
  func.func @transform_13(%arg0: i32) -> (i32, i32) {
    %c0_i32 = arith.constant 0 : i32
    %c0_i32_0 = arith.constant 0 : i32
    %c0_i32_1 = arith.constant 0 : i32
    return %c0_i32, %c0_i32_0 : i32, i32
  }
  func.func @transform_14(%arg0: i32) -> (i32, i32) {
    %c0_i32 = arith.constant 0 : i32
    %c0_i32_0 = arith.constant 0 : i32
    %c0_i32_1 = arith.constant 0 : i32
    return %c0_i32, %c0_i32_0 : i32, i32
  }
  func.func @transform_15(%arg0: i32) -> (i32, i32) {
    %c0_i32 = arith.constant 0 : i32
    %c0_i32_0 = arith.constant 0 : i32
    %c0_i32_1 = arith.constant 0 : i32
    return %c0_i32, %c0_i32_0 : i32, i32
  }
  func.func @transform_16(%arg0: i32) -> (i32, i32) {
    %c0_i32 = arith.constant 0 : i32
    %c0_i32_0 = arith.constant 0 : i32
    %c0_i32_1 = arith.constant 0 : i32
    return %c0_i32, %c0_i32_0 : i32, i32
  }
  func.func @transform_17(%arg0: i32) -> (i32, i32) {
    %c0_i32 = arith.constant 0 : i32
    %c0_i32_0 = arith.constant 0 : i32
    return %arg0, %c0_i32 : i32, i32
  }
  func.func @transform_18(%arg0: i32) -> (i32, i32) {
    %c0_i32 = arith.constant 0 : i32
    %c0_i32_0 = arith.constant 0 : i32
    return %arg0, %c0_i32 : i32, i32
  }
  func.func @transform_19(%arg0: i32) -> (i32, i32) {
    %c0_i32 = arith.constant 0 : i32
    %c0_i32_0 = arith.constant 0 : i32
    return %arg0, %c0_i32 : i32, i32
  }
  func.func @transform_20(%arg0: i32) -> (i32, i32) {
    %c0_i32 = arith.constant 0 : i32
    %c0_i32_0 = arith.constant 0 : i32
    return %arg0, %c0_i32 : i32, i32
  }
}

</mosaic_0001>

<bundles_post_ra>
// kernel: tpu_custom_call.1
= control target key start
LH: loop header
LB: loop body
LE: loop exit
PB: predicated region body
PF: predicated region fallthrough
CT: control target
= control target key end

     0   :  { %s4166_s0 = inlined_call_operand.hbm [shape: f32[8,768], index: 0, kind: input, shape index: {}]   ;;  %s4167_s1 = inlined_call_operand.hbm [shape: f32[8,768], index: 1, kind: input, shape index: {}]   ;;  %s4168_s2 = inlined_call_operand.hbm [shape: f32[8,128], index: 2, kind: input, shape index: {}]   ;;  %s4169_s3 = inlined_call_operand.hbm [shape: bf16[768,128], index: 3, kind: input, shape index: {}]   ;;  %s4170_s4 = inlined_call_operand.hbm [shape: f32[1,128], index: 4, kind: input, shape index: {}]   ;;  %s4171_s5 = inlined_call_operand.hbm [shape: bf16[128,256], index: 5, kind: input, shape index: {}]   ;;  %s4172_s6 = inlined_call_operand.vmem [shape: f32[1,256], index: 6, kind: input, shape index: {}]   ;;  %s4173_s7 = inlined_call_operand.hbm [shape: bf16[768,128], index: 7, kind: input, shape index: {}]   ;;  %s4174_s8 = inlined_call_operand.vmem [shape: f32[1,128], index: 8, kind: input, shape index: {}]   ;;  %s4175_s9 = inlined_call_operand.hbm [shape: bf16[128,256], index: 9, kind: input, shape index: {}]   ;;  %s4176_s10 = inlined_call_operand.vmem [shape: f32[1,256], index: 10, kind: input, shape index: {}]   ;;  %s4177_s11 = inlined_call_operand.hbm [shape: bf16[128,256], index: 11, kind: input, shape index: {}]   ;;  %s4178_s12 = inlined_call_operand.vmem [shape: f32[1,256], index: 12, kind: input, shape index: {}]   ;;  %s4179_s13 = inlined_call_operand.hbm [shape: bf16[128,768], index: 13, kind: input, shape index: {}]   ;;  %s4180_s14 = inlined_call_operand.vmem [shape: f32[1,768], index: 14, kind: input, shape index: {}]   ;;  %s4181_s15 = inlined_call_operand.hbm [shape: bf16[128,768], index: 15, kind: input, shape index: {}]   ;;  %s4182_s16 = inlined_call_operand.vmem [shape: f32[1,768], index: 16, kind: input, shape index: {}]   ;;  %s4183_s17 = inlined_call_operand.hbm [shape: f32[8,768], index: 17, kind: output, shape index: {0}]   ;;  %s4184_s18 = inlined_call_operand.hbm [shape: f32[8,768], index: 18, kind: output, shape index: {1}]   ;;  %s4185_s19 = inlined_call_operand.hbm [shape: f32[8,128], index: 19, kind: output, shape index: {2}]   ;;  %s4186_s20 = inlined_call_operand.hbm [shape: f32[8,128], index: 20, kind: output, shape index: {3}]  }
   0x1   :  { %4196 = sst [smem:[#allocation35_spill]] %s4166_s0 }
   0x2   :  { %4197 = sst [smem:[#allocation36_spill]] %s4167_s1 }
   0x3   :  { %4198 = sst [smem:[#allocation37_spill]] %s4168_s2 }
   0x4   :  { %4199 = sst [smem:[#allocation38_spill]] %s4169_s3 }
   0x5   :  { %4200 = sst [smem:[#allocation39_spill]] %s4170_s4 }
   0x6   :  { %4201 = sst [smem:[#allocation40_spill]] %s4185_s19 }
   0x7   :  { %26 = vsyncpa [#allocation3], 0 }
   0x8   :  { %27 = vsyncpa [#allocation6], 0 }
   0x9   :  { %28 = vsyncpa [#allocation9], 0 }
   0xa   :  { %29 = vsyncpa [#allocation12], 0 }
   0xb   :  { %30 = vsyncpa [#allocation15], 0 }
   0xc   :  { %31 = vsyncpa [#allocation18], 0 }
   0xd   :  { %32 = vsyncpa [#allocation4], 0 }
   0xe   :  { %33 = vsyncpa [#allocation22], 0 }
   0xf   :  { %34 = vsyncpa [#allocation25], 0  ;;  %s3761_s1 = smov [#allocation5]   ;;  %s3762_s23 = smov [#allocation8]  }
  0x10   :  { %s51_s22 = sshll.u32 %s3761_s1, 4  ;;  %s70_s24 = sshll.u32 %s3762_s23, 4  ;;  %s52_s22 = int_to_ptr.vmem [resolvable:$true] %s51_s22  ;;  %s3888_s24 = int_to_ptr.vmem [resolvable:$true] %s70_s24 }
  0x11   :  { %s4202_s3 = sld [smem:[#allocation36_spill]] }
  0x17   :  { %s3413_s26 = scalar_lea.hbm %s4202_s3, 768 }
  0x18   :  { %p3414_p0 = scmp.ne.s32.totalorder %s4202_s3, %s3413_s26  ;;  %p3417_p1 = scmp.lt.u32.totalorder %s3413_s26, %s4202_s3 }
  0x1a   :  { %p3419_p2 = pnand %p3417_p1, %p3414_p0 }
  0x1c   :  { %3422 = shalt.err (!%p3419_p2)
}
  0x1d   :  { %s3423_s30 = scalar_lea.vmem %s52_s22, 768  ;;  %p3428_p4 = scmp.lt.s32.totalorder %s52_s22, %s52_s22 }
  0x1e   :  { %p3424_p3 = scmp.ne.s32.totalorder %s52_s22, %s3423_s30  ;;  %p3429_p5 = scmp.lt.s32.totalorder %s3423_s30, %s3423_s30 }
  0x20   :  { %p3430_p6 = por %p3429_p5, %p3428_p4 }
  0x22   :  { %p3431_p7 = pnand %p3430_p6, %p3424_p3 }
  0x24   :  { %3434 = shalt.err (!%p3431_p7)
}
  0x25   :  { %54 = dma.hbm_to_vmem [thread:$0]  %s4202_s3, 768, %s52_s22, [#allocation6]  }
  0x26   :  { %s4203_s2 = sld [smem:[#allocation38_spill]] }
  0x2c   :  { %s3435_s25 = scalar_lea.hbm %s4203_s2, 6144 }
  0x2d   :  { %p3436_p8 = scmp.ne.s32.totalorder %s4203_s2, %s3435_s25  ;;  %p3439_p9 = scmp.lt.u32.totalorder %s3435_s25, %s4203_s2 }
  0x2f   :  { %p3441_p10 = pnand %p3439_p9, %p3436_p8 }
  0x31   :  { %3444 = shalt.err (!%p3441_p10)
}
  0x32   :  { %s3445_s29 = scalar_lea.vmem %s3888_s24, 6144  ;;  %p3450_p12 = scmp.lt.s32.totalorder %s3888_s24, %s3888_s24 }
  0x33   :  { %p3446_p11 = scmp.ne.s32.totalorder %s3888_s24, %s3445_s29  ;;  %p3451_p13 = scmp.lt.s32.totalorder %s3445_s29, %s3445_s29 }
  0x35   :  { %p3452_p0 = por %p3451_p13, %p3450_p12 }
  0x37   :  { %p3453_p1 = pnand %p3452_p0, %p3446_p11 }
  0x39   :  { %3456 = shalt.err (!%p3453_p1)
}
  0x3a   :  { %s4193_s22 = smov 64   ;;  %s4194_s3 = smov 4  }
  0x3b   :  { %76 = dma.hbm_to_vmem [thread:$0]  %s4203_s2, 6144, %s3888_s24, [#allocation9], %s4193_s22, %s4193_s22, %s4194_s3  }
  0x3c   :  { %s3765_s21 = smov [#allocation11]   ;;  %s3457_s27 = scalar_lea.hbm %s4171_s5, 2048 }
  0x3d   :  { %s92_s1 = sshll.u32 %s3765_s21, 4  ;;  %p3458_p2 = scmp.ne.s32.totalorder %s4171_s5, %s3457_s27  ;;  %s93_s1 = int_to_ptr.vmem [resolvable:$true] %s92_s1 }
  0x3e   :  { %p3461_p3 = scmp.lt.u32.totalorder %s3457_s27, %s4171_s5 }
  0x40   :  { %p3463_p4 = pnand %p3461_p3, %p3458_p2 }
  0x42   :  { %3466 = shalt.err (!%p3463_p4)
}
  0x43   :  { %s3467_s19 = scalar_lea.vmem %s93_s1, 2048  ;;  %p3472_p6 = scmp.lt.s32.totalorder %s93_s1, %s93_s1 }
  0x44   :  { %p3468_p5 = scmp.ne.s32.totalorder %s93_s1, %s3467_s19  ;;  %p3473_p7 = scmp.lt.s32.totalorder %s3467_s19, %s3467_s19 }
  0x46   :  { %p3474_p8 = por %p3473_p7, %p3472_p6 }
  0x48   :  { %p3475_p9 = pnand %p3474_p8, %p3468_p5 }
  0x4a   :  { %3478 = shalt.err (!%p3475_p9)
}
  0x4b   :  { %s4195_s24 = smov 128   ;;  %s3767_s2 = smov 8  }
  0x4c   :  { %98 = dma.hbm_to_vmem [thread:$0]  %s4171_s5, 2048, %s93_s1, [#allocation12], %s4195_s24, %s4195_s24, %s3767_s2  }
  0x4d   :  { %s3768_s21 = smov [#allocation14]   ;;  %s3769_s25 = smov [#allocation17]  }
  0x4e   :  { %s120_s23 = sshll.u32 %s3768_s21, 4  ;;  %s148_s27 = sshll.u32 %s3769_s25, 4  ;;  %s121_s23 = int_to_ptr.vmem [resolvable:$true] %s120_s23  ;;  %s149_s27 = int_to_ptr.vmem [resolvable:$true] %s148_s27 }
  0x4f   :  { %s3479_s19 = scalar_lea.hbm %s4175_s9, 2048 }
  0x50   :  { %p3480_p10 = scmp.ne.s32.totalorder %s4175_s9, %s3479_s19  ;;  %p3483_p11 = scmp.lt.u32.totalorder %s3479_s19, %s4175_s9 }
  0x52   :  { %p3485_p12 = pnand %p3483_p11, %p3480_p10 }
  0x54   :  { %3488 = shalt.err (!%p3485_p12)
}
  0x55   :  { %s3489_s5 = scalar_lea.vmem %s121_s23, 2048  ;;  %p3494_p0 = scmp.lt.s32.totalorder %s121_s23, %s121_s23 }
  0x56   :  { %p3490_p13 = scmp.ne.s32.totalorder %s121_s23, %s3489_s5  ;;  %p3495_p1 = scmp.lt.s32.totalorder %s3489_s5, %s3489_s5 }
  0x58   :  { %p3496_p2 = por %p3495_p1, %p3494_p0 }
  0x5a   :  { %p3497_p3 = pnand %p3496_p2, %p3490_p13 }
  0x5c   :  { %3500 = shalt.err (!%p3497_p3)
}
  0x5d   :  { %126 = dma.hbm_to_vmem [thread:$0]  %s4175_s9, 2048, %s121_s23, [#allocation15], %s4195_s24, %s4195_s24, %s3767_s2  }
  0x5e   :  { %s3501_s3 = scalar_lea.hbm %s4179_s13, 6144 }
  0x5f   :  { %p3502_p4 = scmp.ne.s32.totalorder %s4179_s13, %s3501_s3  ;;  %p3505_p5 = scmp.lt.u32.totalorder %s3501_s3, %s4179_s13 }
  0x61   :  { %p3507_p6 = pnand %p3505_p5, %p3502_p4 }
  0x63   :  { %3510 = shalt.err (!%p3507_p6)
}
  0x64   :  { %s3511_s19 = scalar_lea.vmem %s149_s27, 6144  ;;  %p3516_p8 = scmp.lt.s32.totalorder %s149_s27, %s149_s27 }
  0x65   :  { %p3512_p7 = scmp.ne.s32.totalorder %s149_s27, %s3511_s19  ;;  %p3517_p9 = scmp.lt.s32.totalorder %s3511_s19, %s3511_s19 }
  0x67   :  { %p3518_p10 = por %p3517_p9, %p3516_p8 }
  0x69   :  { %p3519_p11 = pnand %p3518_p10, %p3512_p7 }
  0x6b   :  { %3522 = shalt.err (!%p3519_p11)
}
  0x6c   :  { %s3770_s9 = smov 384   ;;  %s3771_s23 = smov 24  }
  0x6d   :  { %154 = dma.hbm_to_vmem [thread:$0]  %s4179_s13, 6144, %s149_s27, [#allocation18], %s3770_s9, %s3770_s9, %s3771_s23  }
  0x6e   :  { %s3772_s5 = smov [#allocation2]   ;;  %s3773_s30 = smov [#allocation7]  }
  0x6f   :  { %s41_s1 = sshll.u32 %s3772_s5, 4  ;;  %s61_s0 = sshll.u32 %s3773_s30, 4  ;;  %s42_s1 = int_to_ptr.vmem [resolvable:$true] %s41_s1  ;;  %s62_s0 = int_to_ptr.vmem [resolvable:$true] %s61_s0 }
  0x70   :  { %s4204_s21 = sld [smem:[#allocation35_spill]] }
  0x76   :  { %s3523_s25 = scalar_lea.hbm %s4204_s21, 768 }
  0x77   :  { %p3524_p12 = scmp.ne.s32.totalorder %s4204_s21, %s3523_s25  ;;  %p3527_p13 = scmp.lt.u32.totalorder %s3523_s25, %s4204_s21 }
  0x79   :  { %p3529_p0 = pnand %p3527_p13, %p3524_p12 }
  0x7b   :  { %3532 = shalt.err (!%p3529_p0)
}
  0x7c   :  { %s3533_s13 = scalar_lea.vmem %s42_s1, 768  ;;  %p3538_p2 = scmp.lt.s32.totalorder %s42_s1, %s42_s1 }
  0x7d   :  { %p3534_p1 = scmp.ne.s32.totalorder %s42_s1, %s3533_s13  ;;  %p3539_p3 = scmp.lt.s32.totalorder %s3533_s13, %s3533_s13 }
  0x7f   :  { %p3540_p4 = por %p3539_p3, %p3538_p2 }
  0x81   :  { %p3541_p5 = pnand %p3540_p4, %p3534_p1 }
  0x83   :  { %3544 = shalt.err (!%p3541_p5)
}
  0x84   :  { %44 = dma.hbm_to_vmem [thread:$0]  %s4204_s21, 768, %s42_s1, [#allocation3]  }
  0x85   :  { %s4205_s30 = sld [smem:[#allocation37_spill]] }
  0x8b   :  { %s3545_s22 = scalar_lea.hbm %s4205_s30, 128 }
  0x8c   :  { %p3546_p6 = scmp.ne.s32.totalorder %s4205_s30, %s3545_s22  ;;  %p3549_p7 = scmp.lt.u32.totalorder %s3545_s22, %s4205_s30 }
  0x8e   :  { %p3551_p8 = pnand %p3549_p7, %p3546_p6 }
  0x90   :  { %3554 = shalt.err (!%p3551_p8)
}
  0x91   :  { %s3555_s26 = scalar_lea.vmem %s62_s0, 128  ;;  %p3560_p10 = scmp.lt.s32.totalorder %s62_s0, %s62_s0 }
  0x92   :  { %p3556_p9 = scmp.ne.s32.totalorder %s62_s0, %s3555_s26  ;;  %p3561_p11 = scmp.lt.s32.totalorder %s3555_s26, %s3555_s26 }
  0x94   :  { %p3562_p12 = por %p3561_p11, %p3560_p10 }
  0x96   :  { %p3563_p13 = pnand %p3562_p12, %p3556_p9 }
  0x98   :  { %3566 = shalt.err (!%p3563_p13)
}
  0x99   :  { %64 = dma.hbm_to_vmem [thread:$0]  %s4205_s30, 128, %s62_s0, [#allocation6]  }
  0x9a   :  { %s3774_s19 = smov [#allocation10]   ;;  %s3775_s27 = smov [#allocation13]  }
  0x9b   :  { %s83_s13 = sshll.u32 %s3774_s19, 4  ;;  %s106_s4 = sshll.u32 %s3775_s27, 4  ;;  %s84_s13 = int_to_ptr.vmem [resolvable:$true] %s83_s13  ;;  %s107_s4 = int_to_ptr.vmem [resolvable:$true] %s106_s4 }
  0x9c   :  { %s4206_s22 = sld [smem:[#allocation39_spill]] }
  0xa2   :  { %s3567_s24 = scalar_lea.hbm %s4206_s22, 16 }
  0xa3   :  { %p3568_p0 = scmp.ne.s32.totalorder %s4206_s22, %s3567_s24  ;;  %p3571_p1 = scmp.lt.u32.totalorder %s3567_s24, %s4206_s22 }
  0xa5   :  { %p3573_p2 = pnand %p3571_p1, %p3568_p0 }
  0xa7   :  { %3576 = shalt.err (!%p3573_p2)
}
  0xa8   :  { %s3577_s0 = scalar_lea.vmem %s84_s13, 16  ;;  %s3581_s30 = scalar_lea.vmem %s84_s13, 32 }
  0xa9   :  { %p3578_p3 = scmp.ne.s32.totalorder %s84_s13, %s3577_s0  ;;  %p3582_p4 = scmp.lt.s32.totalorder %s84_s13, %s84_s13 }
  0xaa   :  { %p3583_p5 = scmp.lt.s32.totalorder %s3581_s30, %s3577_s0 }
  0xac   :  { %p3584_p6 = por %p3583_p5, %p3582_p4 }
  0xae   :  { %p3585_p7 = pnand %p3584_p6, %p3578_p3 }
  0xb0   :  { %3588 = shalt.err (!%p3585_p7)
}
  0xb1   :  { %86 = dma.hbm_to_vmem [thread:$0]  %s4206_s22, 16, %s84_s13, [#allocation9]  }
  0xb2   :  { %s3589_s29 = scalar_lea.hbm %s4173_s7, 6144 }
  0xb3   :  { %p3590_p8 = scmp.ne.s32.totalorder %s4173_s7, %s3589_s29  ;;  %p3593_p9 = scmp.lt.u32.totalorder %s3589_s29, %s4173_s7 }
  0xb5   :  { %p3595_p10 = pnand %p3593_p9, %p3590_p8 }
  0xb7   :  { %3598 = shalt.err (!%p3595_p10)
}
  0xb8   :  { %s3599_s28 = scalar_lea.vmem %s107_s4, 6144  ;;  %p3604_p12 = scmp.lt.s32.totalorder %s107_s4, %s107_s4 }
  0xb9   :  { %p3600_p11 = scmp.ne.s32.totalorder %s107_s4, %s3599_s28  ;;  %p3605_p13 = scmp.lt.s32.totalorder %s3599_s28, %s3599_s28 }
  0xbb   :  { %p3606_p0 = por %p3605_p13, %p3604_p12 }
  0xbd   :  { %p3607_p1 = pnand %p3606_p0, %p3600_p11 }
  0xbf   :  { %3610 = shalt.err (!%p3607_p1)
}
  0xc0   :  { %s4207_s13 = smov 4   ;;  %s4208_s22 = smov 64  }
  0xc1   :  { %112 = dma.hbm_to_vmem [thread:$0]  %s4173_s7, 6144, %s107_s4, [#allocation12], %s4208_s22, %s4208_s22, %s4207_s13  }
  0xc2   :  { %s3776_s30 = smov [#allocation16]   ;;  %s3777_s21 = smov [#allocation19]  }
  0xc3   :  { %s134_s1 = sshll.u32 %s3776_s30, 4  ;;  %s162_s19 = sshll.u32 %s3777_s21, 4  ;;  %s135_s1 = int_to_ptr.vmem [resolvable:$true] %s134_s1  ;;  %s163_s19 = int_to_ptr.vmem [resolvable:$true] %s162_s19 }
  0xc4   :  { %s3611_s5 = scalar_lea.hbm %s4177_s11, 2048 }
  0xc5   :  { %p3612_p2 = scmp.ne.s32.totalorder %s4177_s11, %s3611_s5  ;;  %p3615_p3 = scmp.lt.u32.totalorder %s3611_s5, %s4177_s11 }
  0xc7   :  { %p3617_p4 = pnand %p3615_p3, %p3612_p2 }
  0xc9   :  { %3620 = shalt.err (!%p3617_p4)
}
  0xca   :  { %s3621_s7 = scalar_lea.vmem %s135_s1, 2048  ;;  %p3626_p6 = scmp.lt.s32.totalorder %s135_s1, %s135_s1 }
  0xcb   :  { %p3622_p5 = scmp.ne.s32.totalorder %s135_s1, %s3621_s7  ;;  %p3627_p7 = scmp.lt.s32.totalorder %s3621_s7, %s3621_s7 }
  0xcd   :  { %p3628_p8 = por %p3627_p7, %p3626_p6 }
  0xcf   :  { %p3629_p9 = pnand %p3628_p8, %p3622_p5 }
  0xd1   :  { %3632 = shalt.err (!%p3629_p9)
}
  0xd2   :  { %s4209_s4 = smov 128   ;;  %s3633_s30 = scalar_lea.hbm %s4181_s15, 6144 }
  0xd3   :  { %140 = dma.hbm_to_vmem [thread:$0]  %s4177_s11, 2048, %s135_s1, [#allocation15], %s4209_s4, %s4209_s4, %s3767_s2  }
  0xd4   :  { %p3634_p10 = scmp.ne.s32.totalorder %s4181_s15, %s3633_s30  ;;  %p3637_p11 = scmp.lt.u32.totalorder %s3633_s30, %s4181_s15 }
  0xd6   :  { %p3639_p12 = pnand %p3637_p11, %p3634_p10 }
  0xd8   :  { %3642 = shalt.err (!%p3639_p12)
}
  0xd9   :  { %s3643_s24 = scalar_lea.vmem %s163_s19, 6144  ;;  %p3648_p0 = scmp.lt.s32.totalorder %s163_s19, %s163_s19 }
  0xda   :  { %p3644_p13 = scmp.ne.s32.totalorder %s163_s19, %s3643_s24  ;;  %p3649_p1 = scmp.lt.s32.totalorder %s3643_s24, %s3643_s24 }
  0xdc   :  { %p3650_p2 = por %p3649_p1, %p3648_p0 }
  0xde   :  { %p3651_p3 = pnand %p3650_p2, %p3644_p13 }
  0xe0   :  { %3654 = shalt.err (!%p3651_p3)
}
  0xe1   :  { %168 = dma.hbm_to_vmem [thread:$0]  %s4181_s15, 6144, %s163_s19, [#allocation18], %s3770_s9, %s3770_s9, %s3771_s23  }
  0xe2   :  { %3743 = dma.done.wait [#allocation3], 768  }
  0xe3   :  { %3744 = vsyncadd [#allocation3], 4294966528 }
  0xe4   :  { %3745 = dma.done.wait [#allocation6], 896  }
  0xe5   :  { %3746 = vsyncadd [#allocation6], 4294966400 }
  0xe6   :  { %3747 = dma.done.wait [#allocation9], 6160  }
  0xe7   :  { %3748 = vsyncadd [#allocation9], 4294961136 }
  0xe8   :  { %3749 = dma.done.wait [#allocation12], 8192  }
  0xe9   :  { %3750 = vsyncadd [#allocation12], 4294959104 }
  0xea   :  { %3751 = dma.done.wait [#allocation15], 4096  }
  0xeb   :  { %3752 = vsyncadd [#allocation15], 4294963200 }
  0xec   :  { %3753 = dma.done.wait [#allocation18], 12288  }
  0xed   :  { %3754 = vsyncadd [#allocation18], 4294955008  ;;  %v3089_v0 = vld [vmem:[#allocation8 + $0x40] sm:$0xff]   ;;  %v3093_v4 = vld [vmem:[#allocation8 + $0x48] sm:$0xff]  }
  0xee   :  { %v3090_v1 = vld [vmem:[#allocation8] sm:$0xff]   ;;  %2935 = vmatprep.subr.bf16.mxu0 %v3089_v0  ;;  %v3094_v5 = vld [vmem:[#allocation8 + $0x8] sm:$0xff]   ;;  %v3097_v8 = vld [vmem:[#allocation8 + $0x50] sm:$0xff]  }
  0xef   :  { %v3091_v2 = vld [vmem:[#allocation8 + $0xc0] sm:$0xff]   ;;  %2936 = vmatpush3.bf16.msra.mxu0 %v3090_v1  ;;  %v3095_v6 = vld [vmem:[#allocation8 + $0xc8] sm:$0xff]   ;;  %v3098_v9 = vld [vmem:[#allocation8 + $0x10] sm:$0xff]  }
  0xf0   :  { %v3092_v3 = vld [vmem:[#allocation8 + $0x80] sm:$0xff]   ;;  %2957 = vmatprep.subr.bf16.mxu1 %v3091_v2  ;;  %2937 = vmatprep.subr.bf16.mxu0 %v3093_v4  ;;  %v3096_v7 = vld [vmem:[#allocation8 + $0x88] sm:$0xff]   ;;  %v3099_v10 = vld [vmem:[#allocation8 + $0xd0] sm:$0xff]  }
  0xf1   :  { %2958 = vmatpush3.bf16.msra.mxu1 %v3092_v3  ;;  %v3100_v11 = vld [vmem:[#allocation8 + $0x90] sm:$0xff]   ;;  %v3101_v12 = vld [vmem:[#allocation8 + $0x58] sm:$0xff]   ;;  %v3105_v16 = vld [vmem:[#allocation8 + $0x60] sm:$0xff]  }
  0xf2   :  { %2959 = vmatprep.subr.bf16.mxu1 %v3095_v6  ;;  %v3102_v13 = vld [vmem:[#allocation8 + $0x18] sm:$0xff]   ;;  %v3106_v17 = vld [vmem:[#allocation8 + $0x20] sm:$0xff]   ;;  %v3109_v20 = vld [vmem:[#allocation8 + $0x68] sm:$0xff]  }
  0xf3   :  { %2938 = vmatpush3.bf16.msra.mxu0 %v3094_v5  ;;  %v3103_v14 = vld [vmem:[#allocation8 + $0xd8] sm:$0xff]   ;;  %v3107_v18 = vld [vmem:[#allocation8 + $0xe0] sm:$0xff]   ;;  %v3110_v21 = vld [vmem:[#allocation8 + $0x28] sm:$0xff]  }
  0xf4   :  { %2939 = vmatprep.subr.bf16.mxu0 %v3097_v8  ;;  %v3104_v15 = vld [vmem:[#allocation8 + $0x98] sm:$0xff]   ;;  %v3108_v19 = vld [vmem:[#allocation8 + $0xa0] sm:$0xff]   ;;  %v3111_v22 = vld [vmem:[#allocation8 + $0xe8] sm:$0xff]  }
  0xf5   :  { %2960 = vmatpush3.bf16.msra.mxu1 %v3096_v7  ;;  %v3112_v23 = vld [vmem:[#allocation8 + $0xa8] sm:$0xff]   ;;  %v3113_v24 = vld [vmem:[#allocation8 + $0x70] sm:$0xff]   ;;  %v3117_v28 = vld [vmem:[#allocation8 + $0x78] sm:$0xff]  }
  0xf6   :  { %2961 = vmatprep.subr.bf16.mxu1 %v3099_v10  ;;  %v3114_v25 = vld [vmem:[#allocation8 + $0x30] sm:$0xff]   ;;  %v3118_v29 = vld [vmem:[#allocation8 + $0x38] sm:$0xff]   ;;  %v206_v31 = vld [vmem:[#allocation2 + $0x8] sm:$0xff] }
  0xf7   :  { %2940 = vmatpush3.bf16.msra.mxu0 %v3098_v9  ;;  %v3115_v26 = vld [vmem:[#allocation8 + $0xf0] sm:$0xff]   ;;  %v3119_v30 = vld [vmem:[#allocation8 + $0xf8] sm:$0xff]   ;;  %v212_v32 = vpack.c.bf16 %v206_v31, %v206_v31  ;;  %v3121_v36 = vld [vmem:[#allocation8 + $0x140] sm:$0xff]  }
  0xf8   :  { %2941 = vmatprep.subr.bf16.mxu0 %v3101_v12  ;;  %v3116_v27 = vld [vmem:[#allocation8 + $0xb0] sm:$0xff]   ;;  %v3120_v33 = vld [vmem:[#allocation8 + $0xb8] sm:$0xff]   ;;  %v3122_v39 = vld [vmem:[#allocation8 + $0x100] sm:$0xff]  }
  0xf9   :  { %2962 = vmatpush3.bf16.msra.mxu1 %v3100_v11  ;;  %v205_v34 = vld [vmem:[#allocation2] sm:$0xff]  ;;  %v208_v37 = vld [vmem:[#allocation2 + $0x18] sm:$0xff]  ;;  %640 = vmatprep.mubr.bf16.mxu0 %v212_v32  ;;  %v207_v40 = vld [vmem:[#allocation2 + $0x10] sm:$0xff] }
  0xfa   :  { %2963 = vmatprep.subr.bf16.mxu1 %v3103_v14  ;;  %v211_v35 = vpack.c.bf16 %v205_v34, %v205_v34  ;;  %v214_v38 = vpack.c.bf16 %v208_v37, %v208_v37  ;;  %v213_v41 = vpack.c.bf16 %v207_v40, %v207_v40  ;;  %v3123_v42 = vld [vmem:[#allocation8 + $0x148] sm:$0xff]   ;;  %v3125_v44 = vld [vmem:[#allocation8 + $0x150] sm:$0xff]   ;;  %v3127_v46 = vld [vmem:[#allocation8 + $0x158] sm:$0xff]  }
  0xfb   :  { %2942 = vmatpush3.bf16.msra.mxu0 %v3102_v13  ;;  %v3124_v43 = vld [vmem:[#allocation8 + $0x108] sm:$0xff]   ;;  %v3126_v45 = vld [vmem:[#allocation8 + $0x110] sm:$0xff]   ;;  %v3128_v47 = vld [vmem:[#allocation8 + $0x118] sm:$0xff]  }
  0xfc   :  { %2943 = vmatprep.subr.bf16.mxu0 %v3105_v16  ;;  %680 = vmatprep.mubr.bf16.mxu1 %v214_v38  ;;  %v3129_v48 = vld [vmem:[#allocation8 + $0x160] sm:$0xff]   ;;  %v3131_v50 = vld [vmem:[#allocation8 + $0x168] sm:$0xff]   ;;  %v3133_v54 = vld [vmem:[#allocation8 + $0x170] sm:$0xff]  }
  0xfd   :  { %2964 = vmatpush3.bf16.msra.mxu1 %v3104_v15  ;;  %v3130_v49 = vld [vmem:[#allocation8 + $0x120] sm:$0xff]   ;;  %v3132_v52 = vld [vmem:[#allocation8 + $0x128] sm:$0xff]   ;;  %v3134_v55 = vld [vmem:[#allocation8 + $0x130] sm:$0xff]  }
  0xfe   :  { %2965 = vmatprep.subr.bf16.mxu1 %v3107_v18  ;;  %v210_v51 = vld [vmem:[#allocation2 + $0x28] sm:$0xff]  ;;  %v3135_v56 = vld [vmem:[#allocation8 + $0x178] sm:$0xff]   ;;  %v3142_v0 = vld [vmem:[#allocation13 + $0x48] sm:$0xff]  }
  0xff   :  { %2944 = vmatpush3.bf16.msra.mxu0 %v3106_v17  ;;  %v216_v53 = vpack.c.bf16 %v210_v51, %v210_v51  ;;  %v3136_v57 = vld [vmem:[#allocation8 + $0x138] sm:$0xff]   ;;  %v3137_v60 = vld [vmem:[#allocation13 + $0x40] sm:$0xff]   ;;  %v3146_v3 = vld [vmem:[#allocation13 + $0x8] sm:$0xff]  }
 0x100   :  { %2945 = vmatprep.subr.bf16.mxu0 %v3109_v20  ;;  %v209_v58 = vld [vmem:[#allocation2 + $0x20] sm:$0xff]  ;;  %v3138_v61 = vld [vmem:[#allocation11] ss:$8 sps:$4 sm:$0xff]   ;;  %v3140_v62 = vld [vmem:[#allocation11 + $0x4] ss:$8 sps:$4 sm:$0xff]  }
 0x101   :  { %2966 = vmatpush3.bf16.msra.mxu1 %v3108_v19  ;;  %v215_v59 = vpack.c.bf16 %v209_v58, %v209_v58  ;;  %v3141_v63 = vld [vmem:[#allocation13] sm:$0xff]   ;;  %v3145_v1 = vld [vmem:[#allocation11 + $0x14] ss:$8 sps:$4 sm:$0xff]   ;;  %v3143_v2 = vld [vmem:[#allocation11 + $0x10] ss:$8 sps:$4 sm:$0xff]  }
 0x102   :  { %2967 = vmatprep.subr.bf16.mxu1 %v3111_v22  ;;  %v3147_v4 = vld [vmem:[#allocation13 + $0x50] sm:$0xff]   ;;  %v3150_v5 = vld [vmem:[#allocation11 + $0x24] ss:$8 sps:$4 sm:$0xff]   ;;  %v3148_v6 = vld [vmem:[#allocation11 + $0x20] ss:$8 sps:$4 sm:$0xff]  }
 0x103   :  { %2946 = vmatpush3.bf16.msra.mxu0 %v3110_v21  ;;  %v3151_v7 = vld [vmem:[#allocation13 + $0x10] sm:$0xff]   ;;  %v3152_v8 = vld [vmem:[#allocation13 + $0x58] sm:$0xff]   ;;  %v3157_v12 = vld [vmem:[#allocation13 + $0x60] sm:$0xff]  }
 0x104   :  { %2947 = vmatprep.subr.bf16.mxu0 %v3113_v24  ;;  %v3155_v9 = vld [vmem:[#allocation11 + $0x34] ss:$8 sps:$4 sm:$0xff]   ;;  %v3153_v10 = vld [vmem:[#allocation11 + $0x30] ss:$8 sps:$4 sm:$0xff]   ;;  %v3160_v13 = vld [vmem:[#allocation11 + $0x44] ss:$8 sps:$4 sm:$0xff]  }
 0x105   :  { %2968 = vmatpush3.bf16.msra.mxu1 %v3112_v23  ;;  %v3156_v11 = vld [vmem:[#allocation13 + $0x18] sm:$0xff]   ;;  %v3158_v14 = vld [vmem:[#allocation11 + $0x40] ss:$8 sps:$4 sm:$0xff]   ;;  %v3167_v20 = vld [vmem:[#allocation13 + $0x70] sm:$0xff]  }
 0x106   :  { %2969 = vmatprep.subr.bf16.mxu1 %v3115_v26  ;;  %v3161_v15 = vld [vmem:[#allocation13 + $0x20] sm:$0xff]   ;;  %v3162_v16 = vld [vmem:[#allocation13 + $0x68] sm:$0xff]   ;;  %v3165_v17 = vld [vmem:[#allocation11 + $0x54] ss:$8 sps:$4 sm:$0xff]  }
 0x107   :  { %2948 = vmatpush3.bf16.msra.mxu0 %v3114_v25  ;;  %v3163_v18 = vld [vmem:[#allocation11 + $0x50] ss:$8 sps:$4 sm:$0xff]   ;;  %v3166_v19 = vld [vmem:[#allocation13 + $0x28] sm:$0xff]   ;;  %v3175_v25 = vld [vmem:[#allocation11 + $0x74] ss:$8 sps:$4 sm:$0xff]  }
 0x108   :  { %2949 = vmatprep.subr.bf16.mxu0 %v3117_v28  ;;  %v3170_v21 = vld [vmem:[#allocation11 + $0x64] ss:$8 sps:$4 sm:$0xff]   ;;  %v3171_v22 = vld [vmem:[#allocation13 + $0x30] sm:$0xff]   ;;  %v3168_v23 = vld [vmem:[#allocation11 + $0x60] ss:$8 sps:$4 sm:$0xff]  }
 0x109   :  { %2970 = vmatpush3.bf16.msra.mxu1 %v3116_v27  ;;  %v3172_v24 = vld [vmem:[#allocation13 + $0x78] sm:$0xff]   ;;  %v882_v28 = vld [vmem:[#allocation5 + $0x8] sm:$0xff]  ;;  %v881_v31 = vld [vmem:[#allocation5] sm:$0xff] }
 0x10a   :  { %2971 = vmatprep.subr.bf16.mxu1 %v3119_v30  ;;  %v3176_v26 = vld [vmem:[#allocation13 + $0x38] sm:$0xff]   ;;  %v3177_v30 = vld [vmem:[#allocation13 + $0x140] sm:$0xff]   ;;  %v887_v32 = vpack.c.bf16 %v881_v31, %v881_v31  ;;  %v3183_v37 = vld [vmem:[#allocation13 + $0x108] sm:$0xff]  }
 0x10b   :  { %2950 = vmatpush3.bf16.msra.mxu0 %v3118_v29  ;;  %v3173_v27 = vld [vmem:[#allocation11 + $0x70] ss:$8 sps:$4 sm:$0xff]   ;;  %v888_v29 = vpack.c.bf16 %v882_v28, %v882_v28  ;;  %v3179_v34 = vld [vmem:[#allocation13 + $0x100] sm:$0xff]  }
 0x10c   :  { %2979 = vmatprep.subr.bf16.mxu0 %v3121_v36  ;;  %v3181_v36 = vld [vmem:[#allocation13 + $0x148] sm:$0xff]   ;;  %v3185_v38 = vld [vmem:[#allocation13 + $0x150] sm:$0xff]   ;;  %v3189_v40 = vld [vmem:[#allocation13 + $0x158] sm:$0xff]  }
 0x10d   :  { %2972 = vmatpush3.bf16.msra.mxu1 %v3120_v33  ;;  %v3178_v33 = vld [vmem:[#allocation13 + $0xc0] sm:$0xff]   ;;  %v883_v28 = vld [vmem:[#allocation5 + $0x10] sm:$0xff] }
 0x10e   :  { %641 = vmatmul.mubr.bf16.vlgmr.msra.gmra.mrb[0].mxu0 %v211_v35  ;;  %838 = vmatprep.subr.bf16.mxu1 %v3140_v62  ;;  %v3778_v35 = vmov 0  }
 0x10f   :  { %2980 = vmatpush3.bf16.msra.mxu0 %v3122_v39  ;;  %720 = vmatprep.mubr.bf16.mxu0 %v216_v53  ;;  %v3187_v39 = vld [vmem:[#allocation13 + $0x110] sm:$0xff]  }
 0x110   :  { %681 = vmatmul.mubr.bf16.vlgmr.msra.gmra.mrb[0].mxu1 %v213_v41  ;;  %2981 = vmatprep.subr.bf16.mxu0 %v3123_v42  ;;  %v3191_v41 = vld [vmem:[#allocation13 + $0x118] sm:$0xff]   ;;  %v3193_v42 = vld [vmem:[#allocation13 + $0x160] sm:$0xff]  }
 0x111   :  { %839 = vmatpush1.bf16.msra.mxu1 %v3138_v61  ;;  %870 = vmatprep.mubr.bf16.mxu1 %v3778_v35 }
 0x112   :  { %840 = vmatprep.subr.bf16.mxu1 %v3145_v1 }
 0x113   :  { %2982 = vmatpush3.bf16.msra.mxu0 %v3124_v43  ;;  %v3195_v43 = vld [vmem:[#allocation13 + $0x120] sm:$0xff]  }
 0x114   :  { %2983 = vmatprep.subr.bf16.mxu0 %v3125_v44  ;;  %v3197_v44 = vld [vmem:[#allocation13 + $0x168] sm:$0xff]  }
 0x115   :  { %841 = vmatpush1.bf16.msra.mxu1 %v3143_v2 }
 0x116   :  { %842 = vmatprep.subr.bf16.mxu1 %v3150_v5 }
 0x117   :  { %2984 = vmatpush3.bf16.msra.mxu0 %v3126_v45  ;;  %v3199_v45 = vld [vmem:[#allocation13 + $0x128] sm:$0xff]  }
 0x118   :  { %2985 = vmatprep.subr.bf16.mxu0 %v3127_v46  ;;  %v3201_v46 = vld [vmem:[#allocation13 + $0x170] sm:$0xff]  }
 0x119   :  { %843 = vmatpush1.bf16.msra.mxu1 %v3148_v6 }
 0x11a   :  { %844 = vmatprep.subr.bf16.mxu1 %v3155_v9  ;;  %v884_v9 = vld [vmem:[#allocation5 + $0x18] sm:$0xff] }
 0x11b   :  { %2986 = vmatpush3.bf16.msra.mxu0 %v3128_v47  ;;  %v3203_v47 = vld [vmem:[#allocation13 + $0x130] sm:$0xff]  }
 0x11c   :  { %2987 = vmatprep.subr.bf16.mxu0 %v3129_v48  ;;  %v3205_v48 = vld [vmem:[#allocation13 + $0x178] sm:$0xff]  }
 0x11d   :  { %845 = vmatpush1.bf16.msra.mxu1 %v3153_v10 }
 0x11e   :  { %846 = vmatprep.subr.bf16.mxu1 %v3160_v13 }
 0x11f   :  { %2988 = vmatpush3.bf16.msra.mxu0 %v3130_v49  ;;  %v3207_v49 = vld [vmem:[#allocation13 + $0x138] sm:$0xff]  }
 0x120   :  { %2989 = vmatprep.subr.bf16.mxu0 %v3131_v50  ;;  %v886_v50 = vld [vmem:[#allocation5 + $0x28] sm:$0xff] }
 0x121   :  { %847 = vmatpush1.bf16.msra.mxu1 %v3158_v14  ;;  %v892_v51 = vpack.c.bf16 %v886_v50, %v886_v50  ;;  %v3182_v14 = vld [vmem:[#allocation13 + $0xc8] sm:$0xff]  }
 0x122   :  { %848 = vmatprep.subr.bf16.mxu1 %v3165_v17  ;;  %v3188_v17 = vld [vmem:[#allocation13 + $0x90] sm:$0xff]  }
 0x123   :  { %2990 = vmatpush3.bf16.msra.mxu0 %v3132_v52  ;;  %v885_v52 = vld [vmem:[#allocation5 + $0x20] sm:$0xff] }
 0x124   :  { %2991 = vmatprep.subr.bf16.mxu0 %v3133_v54  ;;  %v891_v53 = vpack.c.bf16 %v885_v52, %v885_v52  ;;  %v3229_v52 = vld [vmem:[#allocation14 + $0x64] ss:$8 sps:$4 sm:$0xff]  }
 0x125   :  { %849 = vmatpush1.bf16.msra.mxu1 %v3163_v18  ;;  %v3190_v18 = vld [vmem:[#allocation13 + $0xd8] sm:$0xff]  }
 0x126   :  { %850 = vmatprep.subr.bf16.mxu1 %v3170_v21  ;;  %v3196_v21 = vld [vmem:[#allocation13 + $0xa0] sm:$0xff]  }
 0x127   :  { %2992 = vmatpush3.bf16.msra.mxu0 %v3134_v55  ;;  %v2693_v55 = vld [vmem:[#allocation10] ss:$0 sm:$0xff] }
 0x128   :  { %2993 = vmatprep.subr.bf16.mxu0 %v3135_v56 }
 0x129   :  { %851 = vmatpush1.bf16.msra.mxu1 %v3168_v23  ;;  %v3200_v23 = vld [vmem:[#allocation13 + $0xa8] sm:$0xff]  }
 0x12a   :  { %852 = vmatprep.subr.bf16.mxu1 %v3175_v25  ;;  %v3204_v25 = vld [vmem:[#allocation13 + $0xb0] sm:$0xff]  }
 0x12b   :  { %2994 = vmatpush3.bf16.msra.mxu0 %v3136_v57 }
 0x12c   :  { %3001 = vmatprep.subr.bf16.mxu0 %v3137_v60 }
 0x12d   :  { %853 = vmatpush1.bf16.msra.mxu1 %v3173_v27  ;;  %v3208_v27 = vld [vmem:[#allocation13 + $0xb8] sm:$0xff]  }
 0x12e   :  { %721 = vmatmul.mubr.bf16.vlgmr.msra.gmra.mrb[4].mxu0 %v215_v59  ;;  %3023 = vmatprep.subr.bf16.mxu1 %v3178_v33 }
 0x12f   :  { %3002 = vmatpush3.bf16.msra.mxu0 %v3141_v63  ;;  %1316 = vmatprep.mubr.bf16.mxu0 %v888_v29  ;;  %v889_v29 = vpack.c.bf16 %v883_v28, %v883_v28  ;;  %v3247_v28 = vld [vmem:[#allocation16 + $0x44] ss:$8 sps:$4 sm:$0xff]  }
 0x130   :  { %3003 = vmatprep.subr.bf16.mxu0 %v3142_v0 }
 0x133   :  { %3004 = vmatpush3.bf16.msra.mxu0 %v3146_v3 }
 0x134   :  { %3005 = vmatprep.subr.bf16.mxu0 %v3147_v4 }
 0x137   :  { %3006 = vmatpush3.bf16.msra.mxu0 %v3151_v7 }
 0x138   :  { %3007 = vmatprep.subr.bf16.mxu0 %v3152_v8 }
 0x13b   :  { %3008 = vmatpush3.bf16.msra.mxu0 %v3156_v11  ;;  %v3180_v11 = vld [vmem:[#allocation13 + $0x80] sm:$0xff]  }
 0x13c   :  { %3009 = vmatprep.subr.bf16.mxu0 %v3157_v12  ;;  %v890_v12 = vpack.c.bf16 %v884_v9, %v884_v9  ;;  %v2758_v9 = vld [vmem:[%s4174_s8] ss:$0 sm:$0xff] }
 0x13f   :  { %3010 = vmatpush3.bf16.msra.mxu0 %v3161_v15  ;;  %v3184_v15 = vld [vmem:[#allocation13 + $0x88] sm:$0xff]  }
 0x140   :  { %3011 = vmatprep.subr.bf16.mxu0 %v3162_v16  ;;  %v3186_v16 = vld [vmem:[#allocation13 + $0xd0] sm:$0xff]  }
 0x143   :  { %3012 = vmatpush3.bf16.msra.mxu0 %v3166_v19  ;;  %v3192_v19 = vld [vmem:[#allocation13 + $0x98] sm:$0xff]  }
 0x144   :  { %3013 = vmatprep.subr.bf16.mxu0 %v3167_v20  ;;  %v3194_v20 = vld [vmem:[#allocation13 + $0xe0] sm:$0xff]  }
 0x147   :  { %3014 = vmatpush3.bf16.msra.mxu0 %v3171_v22  ;;  %v3198_v22 = vld [vmem:[#allocation13 + $0xe8] sm:$0xff]  }
 0x148   :  { %3015 = vmatprep.subr.bf16.mxu0 %v3172_v24  ;;  %v3202_v24 = vld [vmem:[#allocation13 + $0xf0] sm:$0xff]  }
 0x14b   :  { %3016 = vmatpush3.bf16.msra.mxu0 %v3176_v26  ;;  %v3206_v26 = vld [vmem:[#allocation13 + $0xf8] sm:$0xff]  }
 0x14c   :  { %3045 = vmatprep.subr.bf16.mxu0 %v3177_v30 }
 0x14e   :  { %1317 = vmatmul.mubr.bf16.vlgmr.msra.gmra.mrb[8].mxu0 %v887_v32 }
 0x14f   :  { %3046 = vmatpush3.bf16.msra.mxu0 %v3179_v34  ;;  %1396 = vmatprep.mubr.bf16.mxu0 %v892_v51 }
 0x150   :  { %3047 = vmatprep.subr.bf16.mxu0 %v3181_v36  ;;  %v3211_v36 = vld [vmem:[#allocation14 + $0x4] ss:$8 sps:$4 sm:$0xff]  }
 0x153   :  { %3048 = vmatpush3.bf16.msra.mxu0 %v3183_v37  ;;  %v3209_v37 = vld [vmem:[#allocation14] ss:$8 sps:$4 sm:$0xff]  }
 0x154   :  { %3049 = vmatprep.subr.bf16.mxu0 %v3185_v38  ;;  %v3214_v38 = vld [vmem:[#allocation14 + $0x14] ss:$8 sps:$4 sm:$0xff]  }
 0x157   :  { %3050 = vmatpush3.bf16.msra.mxu0 %v3187_v39  ;;  %v3212_v39 = vld [vmem:[#allocation14 + $0x10] ss:$8 sps:$4 sm:$0xff]  }
 0x158   :  { %3051 = vmatprep.subr.bf16.mxu0 %v3189_v40  ;;  %v3215_v40 = vld [vmem:[#allocation14 + $0x20] ss:$8 sps:$4 sm:$0xff]  }
 0x15b   :  { %3052 = vmatpush3.bf16.msra.mxu0 %v3191_v41  ;;  %v3217_v41 = vld [vmem:[#allocation14 + $0x24] ss:$8 sps:$4 sm:$0xff]  }
 0x15c   :  { %3053 = vmatprep.subr.bf16.mxu0 %v3193_v42  ;;  %v3220_v42 = vld [vmem:[#allocation14 + $0x34] ss:$8 sps:$4 sm:$0xff]  }
 0x15f   :  { %3054 = vmatpush3.bf16.msra.mxu0 %v3195_v43  ;;  %v3218_v43 = vld [vmem:[#allocation14 + $0x30] ss:$8 sps:$4 sm:$0xff]  }
 0x160   :  { %3055 = vmatprep.subr.bf16.mxu0 %v3197_v44  ;;  %v3223_v44 = vld [vmem:[#allocation14 + $0x44] ss:$8 sps:$4 sm:$0xff]  }
 0x163   :  { %3056 = vmatpush3.bf16.msra.mxu0 %v3199_v45  ;;  %v3221_v45 = vld [vmem:[#allocation14 + $0x40] ss:$8 sps:$4 sm:$0xff]  }
 0x164   :  { %3057 = vmatprep.subr.bf16.mxu0 %v3201_v46  ;;  %v3226_v46 = vld [vmem:[#allocation14 + $0x54] ss:$8 sps:$4 sm:$0xff]  }
 0x167   :  { %3058 = vmatpush3.bf16.msra.mxu0 %v3203_v47  ;;  %v3224_v47 = vld [vmem:[#allocation14 + $0x50] ss:$8 sps:$4 sm:$0xff]  }
 0x168   :  { %3059 = vmatprep.subr.bf16.mxu0 %v3205_v48 }
 0x16b   :  { %3060 = vmatpush3.bf16.msra.mxu0 %v3207_v49 }
 0x16e   :  { %1397 = vmatmul.mubr.bf16.vlgmr.msra.gmra.mrb[12].mxu0 %v891_v53 }
 0x16f   :  { %1719 = vmatprep.mubr.bf16.mxu0 %v3778_v35 }
 0x1e1   :  { %v2951_v54 = vpop.f32.mrb[0].mxu0 }
 0x1e2   :  { %v2952_v56 = vpop.f32.mrb[1].mxu0 }
 0x1e3   :  { %v2953_v57 = vadd.f32 %v2952_v56, %v2951_v54  ;;  %v2954_v58 = vpop.f32.mrb[2].mxu0  ;;  %v2973_v59 = vpop.f32.mrb[0].mxu1  ;;  %v3227_v54 = vld [vmem:[#allocation14 + $0x60] ss:$8 sps:$4 sm:$0xff]   ;;  %v3230_v56 = vld [vmem:[#allocation14 + $0x70] ss:$8 sps:$4 sm:$0xff]  }
 0x1e4   :  { %v2955_v60 = vpop.f32.mrb[3].mxu0  ;;  %v2974_v62 = vpop.f32.mrb[1].mxu1 }
 0x1e5   :  { %v643_v61 = vadd.f32 %v2953_v57, %v2693_v55  ;;  %v2975_v63 = vadd.f32 %v2974_v62, %v2973_v59  ;;  %v2976_v0 = vpop.f32.mrb[2].mxu1  ;;  %v3232_v55 = vld [vmem:[#allocation14 + $0x74] ss:$8 sps:$4 sm:$0xff]   ;;  %v748_v57 = vlaneseq }
 0x1e6   :  { %v2977_v1 = vpop.f32.mrb[3].mxu1  ;;  %v746_v60 = vld [vmem:[%s4172_s6] sm:$0x3] }
 0x1e7   :  { %v683_v2 = vadd.f32 %v2975_v63, %v643_v61  ;;  %v4051_v58 = vshrl.u32 %v748_v57, 7 }
 0x1e9   :  { %v4054_v59 = vsub.s32 1, %v4051_v58 }
 0x1eb   :  { %v755_v61 = vrot.slane %v746_v60, %v4054_v59 }
 0x201   :  { %v2995_v3 = vpop.f32.mrb[4].mxu0 }
 0x202   :  { %v2996_v4 = vpop.f32.mrb[5].mxu0 }
 0x203   :  { %v2997_v5 = vadd.f32 %v2996_v4, %v2995_v3  ;;  %v2998_v6 = vpop.f32.mrb[6].mxu0  ;;  %v4061_v4 = vsub.s32 0, %v4051_v58 }
 0x204   :  { %v2999_v7 = vpop.f32.mrb[7].mxu0 }
 0x205   :  { %v723_v8 = vadd.f32 %v2997_v5, %v683_v2  ;;  %v751_v5 = vrot.slane %v746_v60, %v4061_v4 }
 0x207   :  { %v728_v10 = vmax.f32 %v723_v8, 0.0 }
 0x209   :  { %v729_v13 = vpack.c.bf16 %v728_v10, %v728_v10 }
 0x20b   :  { %871 = vmatmul.mubr.bf16.vlgmr.msra.gmra.mrb[4].mxu1 %v729_v13 }
 0x20c   :  { %3024 = vmatpush3.bf16.msra.mxu1 %v3180_v11  ;;  %1356 = vmatprep.mubr.bf16.mxu1 %v890_v12 }
 0x20d   :  { %3025 = vmatprep.subr.bf16.mxu1 %v3182_v14 }
 0x210   :  { %3026 = vmatpush3.bf16.msra.mxu1 %v3184_v15 }
 0x211   :  { %3027 = vmatprep.subr.bf16.mxu1 %v3186_v16 }
 0x214   :  { %3028 = vmatpush3.bf16.msra.mxu1 %v3188_v17 }
 0x215   :  { %3029 = vmatprep.subr.bf16.mxu1 %v3190_v18 }
 0x218   :  { %3030 = vmatpush3.bf16.msra.mxu1 %v3192_v19 }
 0x219   :  { %3031 = vmatprep.subr.bf16.mxu1 %v3194_v20  ;;  %v3235_v20 = vld [vmem:[#allocation16 + $0x4] ss:$8 sps:$4 sm:$0xff]  }
 0x21a   :  { %1687 = vmatprep.subr.bf16.mxu0 %v3235_v20  ;;  %v3266_v20 = vld [vmem:[#allocation17 + $0x38] ss:$24 sps:$4 sm:$0xff]  }
 0x21c   :  { %3032 = vmatpush3.bf16.msra.mxu1 %v3196_v21  ;;  %v3233_v21 = vld [vmem:[#allocation16] ss:$8 sps:$4 sm:$0xff]  }
 0x21d   :  { %3033 = vmatprep.subr.bf16.mxu1 %v3198_v22  ;;  %1688 = vmatpush1.bf16.msra.mxu0 %v3233_v21  ;;  %v3238_v22 = vld [vmem:[#allocation16 + $0x14] ss:$8 sps:$4 sm:$0xff]   ;;  %v3274_v21 = vld [vmem:[#allocation17 + $0x6c] ss:$24 sps:$4 sm:$0xff]  }
 0x21e   :  { %1689 = vmatprep.subr.bf16.mxu0 %v3238_v22  ;;  %v3272_v22 = vld [vmem:[#allocation17 + $0x68] ss:$24 sps:$4 sm:$0xff]  }
 0x220   :  { %3034 = vmatpush3.bf16.msra.mxu1 %v3200_v23  ;;  %v3236_v23 = vld [vmem:[#allocation16 + $0x10] ss:$8 sps:$4 sm:$0xff]  }
 0x221   :  { %3035 = vmatprep.subr.bf16.mxu1 %v3202_v24  ;;  %v3017_v30 = vpop.f32.mrb[8].mxu0  ;;  %1690 = vmatpush1.bf16.msra.mxu0 %v3236_v23  ;;  %v3241_v24 = vld [vmem:[#allocation16 + $0x24] ss:$8 sps:$4 sm:$0xff]   ;;  %v3280_v23 = vld [vmem:[#allocation17 + $0x9c] ss:$24 sps:$4 sm:$0xff]  }
 0x222   :  { %v3018_v31 = vpop.f32.mrb[9].mxu0  ;;  %1691 = vmatprep.subr.bf16.mxu0 %v3241_v24  ;;  %v3278_v24 = vld [vmem:[#allocation17 + $0x98] ss:$24 sps:$4 sm:$0xff]  }
 0x223   :  { %v3019_v32 = vadd.f32 %v3018_v31, %v3017_v30  ;;  %v3020_v33 = vpop.f32.mrb[10].mxu0  ;;  %v3250_v30 = vld [vmem:[#allocation16 + $0x54] ss:$8 sps:$4 sm:$0xff]   ;;  %v3248_v31 = vld [vmem:[#allocation16 + $0x50] ss:$8 sps:$4 sm:$0xff]  }
 0x224   :  { %3036 = vmatpush3.bf16.msra.mxu1 %v3204_v25  ;;  %v3021_v34 = vpop.f32.mrb[11].mxu0  ;;  %v3239_v25 = vld [vmem:[#allocation16 + $0x20] ss:$8 sps:$4 sm:$0xff]  }
 0x225   :  { %3037 = vmatprep.subr.bf16.mxu1 %v3206_v26  ;;  %v1319_v12 = vadd.f32 %v3019_v32, %v2758_v9  ;;  %1692 = vmatpush1.bf16.msra.mxu0 %v3239_v25  ;;  %v3244_v26 = vld [vmem:[#allocation16 + $0x34] ss:$8 sps:$4 sm:$0xff]   ;;  %v3253_v32 = vld [vmem:[#allocation16 + $0x64] ss:$8 sps:$4 sm:$0xff]   ;;  %v3251_v33 = vld [vmem:[#allocation16 + $0x60] ss:$8 sps:$4 sm:$0xff]  }
 0x226   :  { %1693 = vmatprep.subr.bf16.mxu0 %v3244_v26  ;;  %v3256_v34 = vld [vmem:[#allocation16 + $0x74] ss:$8 sps:$4 sm:$0xff]   ;;  %v3286_v25 = vld [vmem:[#allocation17 + $0xcc] ss:$24 sps:$4 sm:$0xff]   ;;  %v3284_v26 = vld [vmem:[#allocation17 + $0xc8] ss:$24 sps:$4 sm:$0xff]  }
 0x228   :  { %3038 = vmatpush3.bf16.msra.mxu1 %v3208_v27  ;;  %v3242_v27 = vld [vmem:[#allocation16 + $0x30] ss:$8 sps:$4 sm:$0xff]  }
 0x229   :  { %1514 = vmatprep.subr.bf16.mxu1 %v3211_v36  ;;  %1694 = vmatpush1.bf16.msra.mxu0 %v3242_v27  ;;  %v3254_v36 = vld [vmem:[#allocation16 + $0x70] ss:$8 sps:$4 sm:$0xff]   ;;  %v3292_v27 = vld [vmem:[#allocation17 + $0xfc] ss:$24 sps:$4 sm:$0xff]  }
 0x22a   :  { %1695 = vmatprep.subr.bf16.mxu0 %v3247_v28  ;;  %v3290_v28 = vld [vmem:[#allocation17 + $0xf8] ss:$24 sps:$4 sm:$0xff]  }
 0x22b   :  { %1357 = vmatmul.mubr.bf16.vlgmr.msra.gmra.mrb[8].mxu1 %v889_v29  ;;  %v3245_v29 = vld [vmem:[#allocation16 + $0x40] ss:$8 sps:$4 sm:$0xff]  }
 0x22c   :  { %1546 = vmatprep.mubr.bf16.mxu1 %v3778_v35  ;;  %1515 = vmatpush1.bf16.msra.mxu1 %v3209_v37  ;;  %v3257_v37 = vld [vmem:[#allocation17] ss:$24 sps:$4 sm:$0xff]  }
 0x22d   :  { %1516 = vmatprep.subr.bf16.mxu1 %v3214_v38  ;;  %1696 = vmatpush1.bf16.msra.mxu0 %v3245_v29  ;;  %v3259_v38 = vld [vmem:[#allocation17 + $0x4] ss:$24 sps:$4 sm:$0xff]  }
 0x22e   :  { %1697 = vmatprep.subr.bf16.mxu0 %v3250_v30  ;;  %v3298_v29 = vld [vmem:[#allocation17 + $0x12c] ss:$24 sps:$4 sm:$0xff]   ;;  %v3296_v30 = vld [vmem:[#allocation17 + $0x128] ss:$24 sps:$4 sm:$0xff]  }
 0x230   :  { %1517 = vmatpush1.bf16.msra.mxu1 %v3212_v39  ;;  %v3262_v39 = vld [vmem:[#allocation17 + $0xc] ss:$24 sps:$4 sm:$0xff]  }
 0x231   :  { %1518 = vmatprep.subr.bf16.mxu1 %v3217_v41  ;;  %1698 = vmatpush1.bf16.msra.mxu0 %v3248_v31  ;;  %v3263_v41 = vld [vmem:[#allocation17 + $0x30] ss:$24 sps:$4 sm:$0xff]   ;;  %v3301_v31 = vld [vmem:[#allocation17 + $0x154] ss:$24 sps:$4 sm:$0xff]  }
 0x232   :  { %1699 = vmatprep.subr.bf16.mxu0 %v3253_v32  ;;  %v3304_v32 = vld [vmem:[#allocation17 + $0x15c] ss:$24 sps:$4 sm:$0xff]  }
 0x234   :  { %1519 = vmatpush1.bf16.msra.mxu1 %v3215_v40  ;;  %v3265_v40 = vld [vmem:[#allocation17 + $0x34] ss:$24 sps:$4 sm:$0xff]  }
 0x235   :  { %1520 = vmatprep.subr.bf16.mxu1 %v3220_v42  ;;  %1700 = vmatpush1.bf16.msra.mxu0 %v3251_v33  ;;  %v3271_v42 = vld [vmem:[#allocation17 + $0x64] ss:$24 sps:$4 sm:$0xff]   ;;  %v3299_v33 = vld [vmem:[#allocation17 + $0x150] ss:$24 sps:$4 sm:$0xff]  }
 0x236   :  { %1701 = vmatprep.subr.bf16.mxu0 %v3256_v34  ;;  %v3302_v34 = vld [vmem:[#allocation17 + $0x158] ss:$24 sps:$4 sm:$0xff]  }
 0x238   :  { %1521 = vmatpush1.bf16.msra.mxu1 %v3218_v43  ;;  %v3269_v43 = vld [vmem:[#allocation17 + $0x60] ss:$24 sps:$4 sm:$0xff]  }
 0x239   :  { %1522 = vmatprep.subr.bf16.mxu1 %v3223_v44  ;;  %1702 = vmatpush1.bf16.msra.mxu0 %v3254_v36  ;;  %v3277_v44 = vld [vmem:[#allocation17 + $0x94] ss:$24 sps:$4 sm:$0xff]  }
 0x23a   :  { %2093 = vmatprep.subr.bf16.mxu0 %v3262_v39  ;;  %v3307_v36 = vld [vmem:[#allocation17 + $0x14] ss:$24 sps:$4 sm:$0xff]  }
 0x23c   :  { %1523 = vmatpush1.bf16.msra.mxu1 %v3221_v45  ;;  %v3275_v45 = vld [vmem:[#allocation17 + $0x90] ss:$24 sps:$4 sm:$0xff]  }
 0x23d   :  { %1524 = vmatprep.subr.bf16.mxu1 %v3226_v46  ;;  %v3283_v46 = vld [vmem:[#allocation17 + $0xc4] ss:$24 sps:$4 sm:$0xff]  }
 0x240   :  { %1525 = vmatpush1.bf16.msra.mxu1 %v3224_v47  ;;  %v3281_v47 = vld [vmem:[#allocation17 + $0xc0] ss:$24 sps:$4 sm:$0xff]  }
 0x241   :  { %v3061_v48 = vpop.f32.mrb[12].mxu0  ;;  %1526 = vmatprep.subr.bf16.mxu1 %v3229_v52  ;;  %v1422_v52 = vld [vmem:[%s4176_s10] sm:$0x3] }
 0x242   :  { %v3062_v49 = vpop.f32.mrb[13].mxu0 }
 0x243   :  { %v3063_v50 = vadd.f32 %v3062_v49, %v3061_v48  ;;  %v3064_v51 = vpop.f32.mrb[14].mxu0  ;;  %v3289_v48 = vld [vmem:[#allocation17 + $0xf4] ss:$24 sps:$4 sm:$0xff]   ;;  %v3287_v49 = vld [vmem:[#allocation17 + $0xf0] ss:$24 sps:$4 sm:$0xff]  }
 0x244   :  { %v3065_v53 = vpop.f32.mrb[15].mxu0  ;;  %1527 = vmatpush1.bf16.msra.mxu1 %v3227_v54  ;;  %v3293_v51 = vld [vmem:[#allocation17 + $0x120] ss:$24 sps:$4 sm:$0xff]  }
 0x245   :  { %1528 = vmatprep.subr.bf16.mxu1 %v3232_v55  ;;  %v1431_v53 = vrot.slane %v1422_v52, %v4054_v59 }
 0x248   :  { %1529 = vmatpush1.bf16.msra.mxu1 %v3230_v56 }
 0x249   :  { %2052 = vmatprep.subr.bf16.mxu1 %v3259_v38  ;;  %v4084_v38 = vld [vmem:[%s4178_s12] sm:$0x3]  ;;  %s3779_s12 = smov [#allocation24]  }
 0x24a   :  { %v1600_v39 = vrot.slane %v4084_v38, %v4061_v4  ;;  %s2668_s3 = sshll.u32 %s3779_s12, 4  ;;  %s2669_s3 = int_to_ptr.vmem [resolvable:$true] %s2668_s3 }
 0x24b   :  { %s3655_s25 = scalar_lea.vmem %s2669_s3, 128  ;;  %p3660_p5 = scmp.lt.s32.totalorder %s2669_s3, %s2669_s3 }
 0x24c   :  { %p3656_p4 = scmp.ne.s32.totalorder %s2669_s3, %s3655_s25  ;;  %p3661_p6 = scmp.lt.s32.totalorder %s3655_s25, %s3655_s25 }
 0x24e   :  { %p3662_p7 = por %p3661_p6, %p3660_p5 }
 0x250   :  { %p3663_p8 = pnand %p3662_p7, %p3656_p4 }
 0x2de   :  { %v872_v62 = vpop.f32.mrb[4].mxu1 }
 0x2df   :  { %v874_v63 = vpop.f32.mrb[5].mxu1  ;;  %v873_v6 = vadd.f32 %v872_v62, %v751_v5  ;;  %v1427_v62 = vrot.slane %v1422_v52, %v4061_v4  ;;  %v3314_v52 = vld [vmem:[#allocation19 + $0x30] ss:$24 sps:$4 sm:$0xff]  }
 0x2e0   :  { %v875_v0 = vadd.f32 %v874_v63, %v755_v61  ;;  %v876_v1 = vpop.f32.mrb[6].mxu1 }
 0x2e1   :  { %v877_v2 = vpop.f32.mrb[7].mxu1 }
 0x2e2   :  { %v879_v3 = vmul.f32 1.442695, %v875_v0 }
 0x2e4   :  { %3401 = vpow2.f32 %v879_v3 }
 0x2ee   :  { %v4064_v7 = vpop.eup %3401 }
 0x2ef   :  { %v4067_v8 = vmul.f32 %v4064_v7, %v873_v6 }
 0x2fe   :  { %v3039_v10 = vpop.f32.mrb[8].mxu1 }
 0x2ff   :  { %v3040_v11 = vpop.f32.mrb[9].mxu1 }
 0x300   :  { %v3041_v13 = vadd.f32 %v3040_v11, %v3039_v10  ;;  %v3042_v14 = vpop.f32.mrb[10].mxu1 }
 0x301   :  { %v3043_v15 = vpop.f32.mrb[11].mxu1 }
 0x302   :  { %v1359_v16 = vadd.f32 %v3041_v13, %v1319_v12  ;;  %v1568_v13 = vld [vmem:[#allocation7] sm:$0xff] }
 0x304   :  { %v1399_v17 = vadd.f32 %v3063_v50, %v1359_v16  ;;  %v3295_v50 = vld [vmem:[#allocation17 + $0x124] ss:$24 sps:$4 sm:$0xff]  }
 0x306   :  { %v1404_v18 = vmax.f32 %v1399_v17, 0.0 }
 0x308   :  { %v1405_v19 = vpack.c.bf16 %v1404_v18, %v1404_v18 }
 0x30a   :  { %1547 = vmatmul.mubr.bf16.vlgmr.msra.gmra.mrb[12].mxu1 %v1405_v19  ;;  %v3268_v19 = vld [vmem:[#allocation17 + $0x3c] ss:$24 sps:$4 sm:$0xff]  }
 0x30b   :  { %2084 = vmatprep.mubr.bf16.mxu1 %v3778_v35  ;;  %2053 = vmatpush1.bf16.msra.mxu1 %v3257_v37  ;;  %v3310_v37 = vld [vmem:[#allocation19 + $0x4] ss:$24 sps:$4 sm:$0xff]  }
 0x30c   :  { %2054 = vmatprep.subr.bf16.mxu1 %v3265_v40 }
 0x30f   :  { %2055 = vmatpush1.bf16.msra.mxu1 %v3263_v41 }
 0x310   :  { %2056 = vmatprep.subr.bf16.mxu1 %v3271_v42 }
 0x313   :  { %2057 = vmatpush1.bf16.msra.mxu1 %v3269_v43 }
 0x314   :  { %2058 = vmatprep.subr.bf16.mxu1 %v3277_v44 }
 0x317   :  { %2059 = vmatpush1.bf16.msra.mxu1 %v3275_v45 }
 0x318   :  { %2060 = vmatprep.subr.bf16.mxu1 %v3283_v46  ;;  %v3305_v46 = vld [vmem:[#allocation17 + $0x10] ss:$24 sps:$4 sm:$0xff]  }
 0x31b   :  { %2061 = vmatpush1.bf16.msra.mxu1 %v3281_v47  ;;  %v3308_v47 = vld [vmem:[#allocation19] ss:$24 sps:$4 sm:$0xff]  }
 0x31c   :  { %2062 = vmatprep.subr.bf16.mxu1 %v3289_v48 }
 0x31f   :  { %2063 = vmatpush1.bf16.msra.mxu1 %v3287_v49  ;;  %v3313_v49 = vld [vmem:[#allocation17 + $0x44] ss:$24 sps:$4 sm:$0xff]  }
 0x320   :  { %2064 = vmatprep.subr.bf16.mxu1 %v3295_v50  ;;  %v3316_v50 = vld [vmem:[#allocation19 + $0x34] ss:$24 sps:$4 sm:$0xff]  }
 0x323   :  { %2065 = vmatpush1.bf16.msra.mxu1 %v3293_v51  ;;  %v3311_v51 = vld [vmem:[#allocation17 + $0x40] ss:$24 sps:$4 sm:$0xff]  }
 0x324   :  { %2066 = vmatprep.subr.bf16.mxu1 %v3301_v31  ;;  %v3368_v31 = vld [vmem:[#allocation19 + $0x70] ss:$24 sps:$4 sm:$0xff]  }
 0x327   :  { %2067 = vmatpush1.bf16.msra.mxu1 %v3299_v33  ;;  %v3376_v33 = vld [vmem:[#allocation19 + $0xa4] ss:$24 sps:$4 sm:$0xff]  }
 0x328   :  { %2134 = vmatprep.subr.bf16.mxu1 %v3307_v36  ;;  %v3374_v36 = vld [vmem:[#allocation19 + $0xa0] ss:$24 sps:$4 sm:$0xff]  }
 0x3dd   :  { %v1548_v54 = vpop.f32.mrb[12].mxu1 }
 0x3de   :  { %v1550_v55 = vpop.f32.mrb[13].mxu1  ;;  %v1549_v63 = vadd.f32 %v1548_v54, %v1427_v62  ;;  %v3322_v54 = vld [vmem:[#allocation19 + $0x64] ss:$24 sps:$4 sm:$0xff]   ;;  %v3326_v62 = vld [vmem:[#allocation19 + $0x90] ss:$24 sps:$4 sm:$0xff]  }
 0x3df   :  { %v1551_v56 = vadd.f32 %v1550_v55, %v1431_v53  ;;  %v1552_v57 = vpop.f32.mrb[14].mxu1  ;;  %v3319_v53 = vld [vmem:[#allocation17 + $0x74] ss:$24 sps:$4 sm:$0xff]   ;;  %v3317_v55 = vld [vmem:[#allocation17 + $0x70] ss:$24 sps:$4 sm:$0xff]  }
 0x3e0   :  { %v1553_v60 = vpop.f32.mrb[15].mxu1  ;;  %v3325_v57 = vld [vmem:[#allocation17 + $0xa4] ss:$24 sps:$4 sm:$0xff]  }
 0x3e1   :  { %v1555_v61 = vmul.f32 1.442695, %v1551_v56  ;;  %v3320_v56 = vld [vmem:[#allocation19 + $0x60] ss:$24 sps:$4 sm:$0xff]   ;;  %v3328_v60 = vld [vmem:[#allocation19 + $0x94] ss:$24 sps:$4 sm:$0xff]  }
 0x3e3   :  { %3403 = vpow2.f32 %v1555_v61  ;;  %v3323_v61 = vld [vmem:[#allocation17 + $0xa0] ss:$24 sps:$4 sm:$0xff]  }
 0x3e4   :  { %3405 = vrcp.f32 %v4064_v7 }
 0x3ed   :  { %v3404_v0 = vpop.eup %3403 }
 0x3ee   :  { %3407 = vrcp.f32 %v3404_v0  ;;  %v1565_v1 = vmul.f32 %v3404_v0, %v1549_v63  ;;  %v3406_v3 = vpop.eup %3405  ;;  %v3331_v63 = vld [vmem:[#allocation17 + $0xd4] ss:$24 sps:$4 sm:$0xff]   ;;  %v3334_v0 = vld [vmem:[#allocation19 + $0xc4] ss:$24 sps:$4 sm:$0xff]  }
 0x3f0   :  { %v1566_v2 = vadd.f32 %v1565_v1, %v4067_v8  ;;  %v3260_v8 = vld [vmem:[#allocation17 + $0x8] ss:$24 sps:$4 sm:$0xff]  }
 0x3f1   :  { %v3329_v1 = vld [vmem:[#allocation17 + $0xd0] ss:$24 sps:$4 sm:$0xff]  }
 0x3f8   :  { %v3408_v5 = vpop.eup %3407 }
 0x3f9   :  { %v1561_v6 = vadd.f32 %v3408_v5, %v3406_v3  ;;  %v3337_v3 = vld [vmem:[#allocation17 + $0x104] ss:$24 sps:$4 sm:$0xff]   ;;  %v3340_v5 = vld [vmem:[#allocation19 + $0xf4] ss:$24 sps:$4 sm:$0xff]  }
 0x3fb   :  { %3409 = vrcp.f32 %v1561_v6  ;;  %v3335_v6 = vld [vmem:[#allocation17 + $0x100] ss:$24 sps:$4 sm:$0xff]  }
 0x405   :  { %v3410_v9 = vpop.eup %3409 }
 0x406   :  { %2631 = vst [vmem:[#allocation24] sm:$0xff] %v3410_v9  ;;  %v1567_v10 = vmul.f32 %v3410_v9, %v1566_v2  ;;  %3411 = vrsqrt.f32 %v3410_v9  ;;  %vm1571_vm0 = vcmp.eq.f32.partialorder %v3410_v9, inf  ;;  %v1574_v14 = vand.u32 2147483648, %v3410_v9  ;;  %v3332_v2 = vld [vmem:[#allocation19 + $0xc0] ss:$24 sps:$4 sm:$0xff]  }
 0x407   :  { %vm1573_vm1 = vcmp.eq.f32.partialorder %v3410_v9, 0.0 }
 0x408   :  { %2630 = vst [vmem:[#allocation23] sm:$0xff] %v1567_v10 }
 0x410   :  { %v3412_v11 = vpop.eup %3411 }
 0x411   :  { %v1570_v12 = vmul.f32 %v3412_v11, %v3410_v9  ;;  %v3343_v11 = vld [vmem:[#allocation17 + $0x134] ss:$24 sps:$4 sm:$0xff]  }
 0x413   :  { %v1572_v15 = vsel %vm1571_vm0, %v3410_v9, %v1570_v12  ;;  %v3338_v9 = vld [vmem:[#allocation19 + $0xf0] ss:$24 sps:$4 sm:$0xff]   ;;  %v3346_v12 = vld [vmem:[#allocation19 + $0x124] ss:$24 sps:$4 sm:$0xff]  }
 0x414   :  { %v1575_v7 = vsel %vm1573_vm1, %v1574_v14, %v1572_v15  ;;  %v3344_v14 = vld [vmem:[#allocation19 + $0x120] ss:$24 sps:$4 sm:$0xff]  }
 0x415   :  { %v1576_v16 = vmul.f32 %v1575_v7, %v1568_v13  ;;  %v3341_v13 = vld [vmem:[#allocation17 + $0x130] ss:$24 sps:$4 sm:$0xff]   ;;  %v3349_v7 = vld [vmem:[#allocation17 + $0x164] ss:$24 sps:$4 sm:$0xff]  }
 0x417   :  { %v1577_v17 = vadd.f32 %v1576_v16, %v1567_v10  ;;  %v1604_v10 = vrot.slane %v4084_v38, %v4054_v59  ;;  %v3352_v16 = vld [vmem:[#allocation19 + $0x154] ss:$24 sps:$4 sm:$0xff]  }
 0x418   :  { %v3382_v38 = vld [vmem:[#allocation19 + $0xd4] ss:$24 sps:$4 sm:$0xff]  }
 0x419   :  { %v1578_v18 = vpack.c.bf16 %v1577_v17, %v1577_v17  ;;  %v3347_v17 = vld [vmem:[#allocation17 + $0x160] ss:$24 sps:$4 sm:$0xff]  }
 0x41b   :  { %1720 = vmatmul.mubr.bf16.vlgmr.msra.gmra.mrb[16].mxu0 %v1578_v18 }
 0x41c   :  { %2094 = vmatpush1.bf16.msra.mxu0 %v3260_v8  ;;  %2125 = vmatprep.mubr.bf16.mxu0 %v3778_v35  ;;  %v3350_v8 = vld [vmem:[#allocation19 + $0x150] ss:$24 sps:$4 sm:$0xff]  }
 0x41d   :  { %2095 = vmatprep.subr.bf16.mxu0 %v3268_v19  ;;  %v3355_v19 = vld [vmem:[#allocation19 + $0xc] ss:$24 sps:$4 sm:$0xff]  }
 0x420   :  { %2096 = vmatpush1.bf16.msra.mxu0 %v3266_v20  ;;  %v3358_v20 = vld [vmem:[#allocation19 + $0x14] ss:$24 sps:$4 sm:$0xff]  }
 0x421   :  { %2097 = vmatprep.subr.bf16.mxu0 %v3274_v21  ;;  %v3353_v21 = vld [vmem:[#allocation19 + $0x8] ss:$24 sps:$4 sm:$0xff]  }
 0x424   :  { %2098 = vmatpush1.bf16.msra.mxu0 %v3272_v22  ;;  %v3356_v22 = vld [vmem:[#allocation19 + $0x10] ss:$24 sps:$4 sm:$0xff]  }
 0x425   :  { %2099 = vmatprep.subr.bf16.mxu0 %v3280_v23 }
 0x428   :  { %2100 = vmatpush1.bf16.msra.mxu0 %v3278_v24  ;;  %v3361_v24 = vld [vmem:[#allocation19 + $0x3c] ss:$24 sps:$4 sm:$0xff]  }
 0x429   :  { %2101 = vmatprep.subr.bf16.mxu0 %v3286_v25  ;;  %v3364_v25 = vld [vmem:[#allocation19 + $0x44] ss:$24 sps:$4 sm:$0xff]  }
 0x42c   :  { %2102 = vmatpush1.bf16.msra.mxu0 %v3284_v26  ;;  %v3359_v26 = vld [vmem:[#allocation19 + $0x38] ss:$24 sps:$4 sm:$0xff]  }
 0x42d   :  { %2103 = vmatprep.subr.bf16.mxu0 %v3292_v27  ;;  %v3362_v27 = vld [vmem:[#allocation19 + $0x40] ss:$24 sps:$4 sm:$0xff]  }
 0x430   :  { %2104 = vmatpush1.bf16.msra.mxu0 %v3290_v28  ;;  %v3367_v28 = vld [vmem:[#allocation19 + $0x6c] ss:$24 sps:$4 sm:$0xff]  }
 0x431   :  { %2105 = vmatprep.subr.bf16.mxu0 %v3298_v29  ;;  %v3370_v29 = vld [vmem:[#allocation19 + $0x74] ss:$24 sps:$4 sm:$0xff]  }
 0x434   :  { %2106 = vmatpush1.bf16.msra.mxu0 %v3296_v30  ;;  %v3365_v30 = vld [vmem:[#allocation19 + $0x68] ss:$24 sps:$4 sm:$0xff]  }
 0x435   :  { %2107 = vmatprep.subr.bf16.mxu0 %v3304_v32  ;;  %v3373_v32 = vld [vmem:[#allocation19 + $0x9c] ss:$24 sps:$4 sm:$0xff]  }
 0x438   :  { %2108 = vmatpush1.bf16.msra.mxu0 %v3302_v34  ;;  %v3371_v34 = vld [vmem:[#allocation19 + $0x98] ss:$24 sps:$4 sm:$0xff]  }
 0x439   :  { %2501 = vmatprep.subr.bf16.mxu0 %v3310_v37  ;;  %v3379_v37 = vld [vmem:[#allocation19 + $0xcc] ss:$24 sps:$4 sm:$0xff]  }
 0x4ee   :  { %v1721_v40 = vpop.f32.mrb[16].mxu0 }
 0x4ef   :  { %v1722_v41 = vadd.f32 %v1721_v40, %v1600_v39  ;;  %v1723_v42 = vpop.f32.mrb[17].mxu0  ;;  %v3377_v39 = vld [vmem:[#allocation19 + $0xc8] ss:$24 sps:$4 sm:$0xff]   ;;  %v3385_v40 = vld [vmem:[#allocation19 + $0xfc] ss:$24 sps:$4 sm:$0xff]  }
 0x4f0   :  { %v1725_v43 = vpop.f32.mrb[18].mxu0  ;;  %v1724_v15 = vadd.f32 %v1723_v42, %v1604_v10  ;;  %v3383_v42 = vld [vmem:[#allocation19 + $0xf8] ss:$24 sps:$4 sm:$0xff]  }
 0x4f1   :  { %v1728_v44 = vmax.f32 %v1722_v41, 0.0  ;;  %v1726_v45 = vpop.f32.mrb[19].mxu0  ;;  %v3388_v41 = vld [vmem:[#allocation19 + $0x104] ss:$24 sps:$4 sm:$0xff]   ;;  %v3386_v43 = vld [vmem:[#allocation19 + $0x100] ss:$24 sps:$4 sm:$0xff]  }
 0x4f2   :  { %v1729_v18 = vmax.f32 %v1724_v15, 0.0  ;;  %v3394_v45 = vld [vmem:[#allocation19 + $0x134] ss:$24 sps:$4 sm:$0xff]  }
 0x4f3   :  { %v4088_v48 = vpack.c.bf16 %v1728_v44, %v1728_v44  ;;  %v3391_v44 = vld [vmem:[#allocation19 + $0x12c] ss:$24 sps:$4 sm:$0xff]  }
 0x4f4   :  { %v4096_v23 = vpack.c.bf16 %v1729_v18, %v1729_v18 }
 0x4f5   :  { %2085 = vmatmul.mubr.bf16.vlgmr.msra.gmra.mrb[16].mxu1 %v4088_v48  ;;  %2126 = vmatmul.mubr.bf16.vlgmr.msra.gmra.mrb[20].mxu0 %v4088_v48 }
 0x4f6   :  { %2135 = vmatpush1.bf16.msra.mxu1 %v3305_v46  ;;  %2502 = vmatpush1.bf16.msra.mxu0 %v3308_v47  ;;  %v3389_v46 = vld [vmem:[#allocation19 + $0x128] ss:$24 sps:$4 sm:$0xff]  }
 0x4f7   :  { %2136 = vmatprep.subr.bf16.mxu1 %v3313_v49  ;;  %2503 = vmatprep.subr.bf16.mxu0 %v3316_v50  ;;  %v3392_v47 = vld [vmem:[#allocation19 + $0x130] ss:$24 sps:$4 sm:$0xff]   ;;  %v3400_v49 = vld [vmem:[#allocation19 + $0x164] ss:$24 sps:$4 sm:$0xff]  }
 0x4f8   :  { %2166 = vmatprep.mubr.bf16.mxu1 %v3778_v35  ;;  %2533 = vmatprep.mubr.bf16.mxu0 %v3778_v35  ;;  %v3395_v50 = vld [vmem:[#allocation19 + $0x158] ss:$24 sps:$4 sm:$0xff]  }
 0x4fa   :  { %2137 = vmatpush1.bf16.msra.mxu1 %v3311_v51  ;;  %2504 = vmatpush1.bf16.msra.mxu0 %v3314_v52  ;;  %v3398_v51 = vld [vmem:[#allocation19 + $0x160] ss:$24 sps:$4 sm:$0xff]  }
 0x4fb   :  { %2138 = vmatprep.subr.bf16.mxu1 %v3319_v53  ;;  %2505 = vmatprep.subr.bf16.mxu0 %v3322_v54 }
 0x4fe   :  { %2139 = vmatpush1.bf16.msra.mxu1 %v3317_v55  ;;  %2506 = vmatpush1.bf16.msra.mxu0 %v3320_v56 }
 0x4ff   :  { %2140 = vmatprep.subr.bf16.mxu1 %v3325_v57  ;;  %2507 = vmatprep.subr.bf16.mxu0 %v3328_v60 }
 0x502   :  { %2141 = vmatpush1.bf16.msra.mxu1 %v3323_v61  ;;  %2508 = vmatpush1.bf16.msra.mxu0 %v3326_v62 }
 0x503   :  { %2142 = vmatprep.subr.bf16.mxu1 %v3331_v63  ;;  %2509 = vmatprep.subr.bf16.mxu0 %v3334_v0 }
 0x506   :  { %2143 = vmatpush1.bf16.msra.mxu1 %v3329_v1  ;;  %2510 = vmatpush1.bf16.msra.mxu0 %v3332_v2 }
 0x507   :  { %2144 = vmatprep.subr.bf16.mxu1 %v3337_v3  ;;  %2511 = vmatprep.subr.bf16.mxu0 %v3340_v5 }
 0x50a   :  { %2145 = vmatpush1.bf16.msra.mxu1 %v3335_v6  ;;  %2512 = vmatpush1.bf16.msra.mxu0 %v3338_v9 }
 0x50b   :  { %2146 = vmatprep.subr.bf16.mxu1 %v3343_v11  ;;  %2513 = vmatprep.subr.bf16.mxu0 %v3346_v12 }
 0x50e   :  { %2147 = vmatpush1.bf16.msra.mxu1 %v3341_v13  ;;  %2514 = vmatpush1.bf16.msra.mxu0 %v3344_v14 }
 0x50f   :  { %2148 = vmatprep.subr.bf16.mxu1 %v3349_v7  ;;  %2515 = vmatprep.subr.bf16.mxu0 %v3352_v16 }
 0x512   :  { %2149 = vmatpush1.bf16.msra.mxu1 %v3347_v17  ;;  %2516 = vmatpush1.bf16.msra.mxu0 %v3350_v8 }
 0x513   :  { %2542 = vmatprep.subr.bf16.mxu1 %v3355_v19  ;;  %2583 = vmatprep.subr.bf16.mxu0 %v3358_v20 }
 0x515   :  { %2167 = vmatmul.mubr.bf16.vlgmr.msra.gmra.mrb[20].mxu1 %v4088_v48  ;;  %2534 = vmatmul.mubr.bf16.vlgmr.msra.gmra.mrb[24].mxu0 %v4096_v23  ;;  %v3397_v48 = vld [vmem:[#allocation19 + $0x15c] ss:$24 sps:$4 sm:$0xff]  }
 0x516   :  { %2543 = vmatpush1.bf16.msra.mxu1 %v3353_v21  ;;  %2584 = vmatpush1.bf16.msra.mxu0 %v3356_v22 }
 0x517   :  { %2544 = vmatprep.subr.bf16.mxu1 %v3361_v24  ;;  %2585 = vmatprep.subr.bf16.mxu0 %v3364_v25 }
 0x518   :  { %2574 = vmatprep.mubr.bf16.mxu1 %v3778_v35  ;;  %2615 = vmatprep.mubr.bf16.mxu0 %v3778_v35  ;;  %v3380_v35 = vld [vmem:[#allocation19 + $0xd0] ss:$24 sps:$4 sm:$0xff]  }
 0x51a   :  { %2545 = vmatpush1.bf16.msra.mxu1 %v3359_v26  ;;  %2586 = vmatpush1.bf16.msra.mxu0 %v3362_v27 }
 0x51b   :  { %2546 = vmatprep.subr.bf16.mxu1 %v3367_v28  ;;  %2587 = vmatprep.subr.bf16.mxu0 %v3370_v29 }
 0x51e   :  { %2547 = vmatpush1.bf16.msra.mxu1 %v3365_v30  ;;  %2588 = vmatpush1.bf16.msra.mxu0 %v3368_v31 }
 0x51f   :  { %2548 = vmatprep.subr.bf16.mxu1 %v3373_v32  ;;  %2589 = vmatprep.subr.bf16.mxu0 %v3376_v33 }
 0x522   :  { %2549 = vmatpush1.bf16.msra.mxu1 %v3371_v34  ;;  %2590 = vmatpush1.bf16.msra.mxu0 %v3374_v36 }
 0x523   :  { %2550 = vmatprep.subr.bf16.mxu1 %v3379_v37  ;;  %2591 = vmatprep.subr.bf16.mxu0 %v3382_v38 }
 0x526   :  { %2551 = vmatpush1.bf16.msra.mxu1 %v3377_v39  ;;  %2592 = vmatpush1.bf16.msra.mxu0 %v3380_v35 }
 0x527   :  { %2552 = vmatprep.subr.bf16.mxu1 %v3385_v40  ;;  %2593 = vmatprep.subr.bf16.mxu0 %v3388_v41 }
 0x52a   :  { %2553 = vmatpush1.bf16.msra.mxu1 %v3383_v42  ;;  %2594 = vmatpush1.bf16.msra.mxu0 %v3386_v43 }
 0x52b   :  { %2554 = vmatprep.subr.bf16.mxu1 %v3391_v44  ;;  %2595 = vmatprep.subr.bf16.mxu0 %v3394_v45 }
 0x52e   :  { %2555 = vmatpush1.bf16.msra.mxu1 %v3389_v46  ;;  %2596 = vmatpush1.bf16.msra.mxu0 %v3392_v47 }
 0x52f   :  { %2556 = vmatprep.subr.bf16.mxu1 %v3397_v48  ;;  %2597 = vmatprep.subr.bf16.mxu0 %v3400_v49 }
 0x532   :  { %2557 = vmatpush1.bf16.msra.mxu1 %v3395_v50  ;;  %2598 = vmatpush1.bf16.msra.mxu0 %v3398_v51 }
 0x535   :  { %2575 = vmatmul.mubr.bf16.vlgmr.msra.gmra.mrb[24].mxu1 %v4096_v23  ;;  %2616 = vmatmul.mubr.bf16.vlgmr.msra.gmra.mrb[28].mxu0 %v4096_v23 }
 0x536   :  { %3666 = shalt.err (!%p3663_p8)
}
 0x537   :  { %s3667_s4 = scalar_lea.hbm %s4186_s20, 128 }
 0x538   :  { %p3668_p9 = scmp.ne.s32.totalorder %s4186_s20, %s3667_s4  ;;  %p3671_p10 = scmp.lt.u32.totalorder %s3667_s4, %s4186_s20 }
 0x53a   :  { %p3673_p11 = pnand %p3671_p10, %p3668_p9 }
 0x53c   :  { %3676 = shalt.err (!%p3673_p11)
}
 0x53d   :  { %2671 = dma.vmem_to_hbm [thread:$0]  %s2669_s3, 128, %s4186_s20, [#allocation25]   ;;  %v1792_v52 = vsub.s32 2, %v4051_v58  ;;  %v1780_v53 = vld [vmem:[%s4180_s14] sm:$0x3f]  ;;  %v1796_v54 = vsub.s32 3, %v4051_v58 }
 0x53e   :  { %v1785_v55 = vrot.slane %v1780_v53, %v4061_v4  ;;  %v1789_v57 = vrot.slane %v1780_v53, %v4054_v59  ;;  %v1800_v12 = vsub.s32 4, %v4051_v58  ;;  %v2229_v13 = vld [vmem:[%s4182_s16] sm:$0x3f]  ;;  %v1804_v14 = vsub.s32 5, %v4051_v58  ;;  %s3780_s5 = smov [#allocation20]  }
 0x53f   :  { %v1793_v56 = vrot.slane %v1780_v53, %v1792_v52  ;;  %v1797_v60 = vrot.slane %v1780_v53, %v1796_v54  ;;  %v2234_v7 = vrot.slane %v2229_v13, %v4061_v4  ;;  %v2238_v17 = vrot.slane %v2229_v13, %v4054_v59  ;;  %s2638_s24 = sshll.u32 %s3780_s5, 4  ;;  %s2639_s24 = int_to_ptr.vmem [resolvable:$true] %s2638_s24 }
 0x540   :  { %v1801_v15 = vrot.slane %v1780_v53, %v1800_v12  ;;  %v1805_v16 = vrot.slane %v1780_v53, %v1804_v14  ;;  %s3677_s16 = scalar_lea.vmem %s2639_s24, 768  ;;  %p3682_p13 = scmp.lt.s32.totalorder %s2639_s24, %s2639_s24 }
 0x541   :  { %p3678_p12 = scmp.ne.s32.totalorder %s2639_s24, %s3677_s16  ;;  %p3683_p0 = scmp.lt.s32.totalorder %s3677_s16, %s3677_s16 }
 0x543   :  { %p3684_p1 = por %p3683_p0, %p3682_p13 }
 0x545   :  { %p3685_p2 = pnand %p3684_p1, %p3678_p12 }
 0x5c8   :  { %v2086_v61 = vpop.f32.mrb[16].mxu1  ;;  %v2127_v62 = vpop.f32.mrb[20].mxu0 }
 0x5c9   :  { %v2087_v63 = vadd.f32 %v2086_v61, %v1785_v55  ;;  %v2128_v0 = vadd.f32 %v2127_v62, %v1793_v56  ;;  %v2088_v1 = vpop.f32.mrb[17].mxu1  ;;  %v2129_v2 = vpop.f32.mrb[21].mxu0 }
 0x5ca   :  { %v2089_v3 = vadd.f32 %v2088_v1, %v1789_v57  ;;  %v2130_v5 = vadd.f32 %v2129_v2, %v1797_v60  ;;  %v2090_v6 = vpop.f32.mrb[18].mxu1  ;;  %v2131_v9 = vpop.f32.mrb[22].mxu0 }
 0x5cb   :  { %2175 = vst [vmem:[#allocation20] sm:$0xff] %v2087_v63  ;;  %2177 = vst [vmem:[#allocation20 + $0x10] sm:$0xff] %v2128_v0  ;;  %v2091_v10 = vpop.f32.mrb[19].mxu1  ;;  %v2132_v11 = vpop.f32.mrb[23].mxu0 }
 0x5cc   :  { %2176 = vst [vmem:[#allocation20 + $0x8] sm:$0xff] %v2089_v3  ;;  %2178 = vst [vmem:[#allocation20 + $0x18] sm:$0xff] %v2130_v5 }
 0x5e8   :  { %v2168_v8 = vpop.f32.mrb[20].mxu1  ;;  %v2535_v18 = vpop.f32.mrb[24].mxu0 }
 0x5e9   :  { %v2169_v19 = vadd.f32 %v2168_v8, %v1801_v15  ;;  %v2536_v20 = vadd.f32 %v2535_v18, %v2234_v7  ;;  %v2170_v21 = vpop.f32.mrb[21].mxu1  ;;  %v2537_v22 = vpop.f32.mrb[25].mxu0 }
 0x5ea   :  { %v2171_v23 = vadd.f32 %v2170_v21, %v1805_v16  ;;  %v2538_v24 = vadd.f32 %v2537_v22, %v2238_v17  ;;  %v2172_v25 = vpop.f32.mrb[22].mxu1  ;;  %v2539_v26 = vpop.f32.mrb[26].mxu0 }
 0x5eb   :  { %2179 = vst [vmem:[#allocation20 + $0x20] sm:$0xff] %v2169_v19  ;;  %2624 = vst [vmem:[#allocation21] sm:$0xff] %v2536_v20  ;;  %v2173_v58 = vpop.f32.mrb[23].mxu1  ;;  %v2540_v4 = vpop.f32.mrb[27].mxu0 }
 0x5ec   :  { %2180 = vst [vmem:[#allocation20 + $0x28] sm:$0xff] %v2171_v23  ;;  %2625 = vst [vmem:[#allocation21 + $0x8] sm:$0xff] %v2538_v24 }
 0x5ed   :  { %3688 = shalt.err (!%p3685_p2)
}
 0x5ee   :  { %s3689_s15 = scalar_lea.hbm %s4183_s17, 768 }
 0x5ef   :  { %p3690_p3 = scmp.ne.s32.totalorder %s4183_s17, %s3689_s15  ;;  %p3693_p4 = scmp.lt.u32.totalorder %s3689_s15, %s4183_s17 }
 0x5f1   :  { %p3695_p5 = pnand %p3693_p4, %p3690_p3 }
 0x5f3   :  { %3698 = shalt.err (!%p3695_p5)
}
 0x5f4   :  { %2641 = dma.vmem_to_hbm [thread:$0]  %s2639_s24, 768, %s4183_s17, [#allocation4]   ;;  %v2242_v59 = vrot.slane %v2229_v13, %v1792_v52  ;;  %v2250_v27 = vrot.slane %v2229_v13, %v1800_v12  ;;  %v2246_v28 = vrot.slane %v2229_v13, %v1796_v54  ;;  %v2254_v29 = vrot.slane %v2229_v13, %v1804_v14 }
 0x5f5   :  { %s3781_s19 = smov [#allocation21]   ;;  %s3782_s3 = smov [#allocation23]  }
 0x5f6   :  { %s2648_s12 = sshll.u32 %s3781_s19, 4  ;;  %s2658_s25 = sshll.u32 %s3782_s3, 4  ;;  %s2649_s12 = int_to_ptr.vmem [resolvable:$true] %s2648_s12  ;;  %s2659_s25 = int_to_ptr.vmem [resolvable:$true] %s2658_s25 }
 0x5f7   :  { %s3699_s17 = scalar_lea.vmem %s2649_s12, 768  ;;  %p3704_p7 = scmp.lt.s32.totalorder %s2649_s12, %s2649_s12 }
 0x5f8   :  { %p3700_p6 = scmp.ne.s32.totalorder %s2649_s12, %s3699_s17  ;;  %p3705_p8 = scmp.lt.s32.totalorder %s3699_s17, %s3699_s17 }
 0x5fa   :  { %p3706_p9 = por %p3705_p8, %p3704_p7 }
 0x5fc   :  { %p3707_p10 = pnand %p3706_p9, %p3700_p6 }
 0x608   :  { %v2576_v30 = vpop.f32.mrb[24].mxu1  ;;  %v2617_v31 = vpop.f32.mrb[28].mxu0 }
 0x609   :  { %v2577_v32 = vadd.f32 %v2576_v30, %v2242_v59  ;;  %v2618_v33 = vadd.f32 %v2617_v31, %v2250_v27  ;;  %v2578_v34 = vpop.f32.mrb[25].mxu1  ;;  %v2619_v36 = vpop.f32.mrb[29].mxu0 }
 0x60a   :  { %v2579_v37 = vadd.f32 %v2578_v34, %v2246_v28  ;;  %v2620_v38 = vadd.f32 %v2619_v36, %v2254_v29  ;;  %v2580_v39 = vpop.f32.mrb[26].mxu1  ;;  %v2621_v35 = vpop.f32.mrb[30].mxu0 }
 0x60b   :  { %2626 = vst [vmem:[#allocation21 + $0x10] sm:$0xff] %v2577_v32  ;;  %2628 = vst [vmem:[#allocation21 + $0x20] sm:$0xff] %v2618_v33  ;;  %v2581_v40 = vpop.f32.mrb[27].mxu1  ;;  %v2622_v41 = vpop.f32.mrb[31].mxu0 }
 0x60c   :  { %2627 = vst [vmem:[#allocation21 + $0x18] sm:$0xff] %v2579_v37  ;;  %2629 = vst [vmem:[#allocation21 + $0x28] sm:$0xff] %v2620_v38 }
 0x60d   :  { %3710 = shalt.err (!%p3707_p10)
}
 0x60e   :  { %s3711_s4 = scalar_lea.hbm %s4184_s18, 768 }
 0x60f   :  { %p3712_p11 = scmp.ne.s32.totalorder %s4184_s18, %s3711_s4  ;;  %p3715_p12 = scmp.lt.u32.totalorder %s3711_s4, %s4184_s18 }
 0x611   :  { %p3717_p13 = pnand %p3715_p12, %p3712_p11 }
 0x613   :  { %3720 = shalt.err (!%p3717_p13)
}
 0x614   :  { %2651 = dma.vmem_to_hbm [thread:$0]  %s2649_s12, 768, %s4184_s18, [#allocation22]  }
 0x615   :  { %s3721_s27 = scalar_lea.vmem %s2659_s25, 128  ;;  %p3726_p1 = scmp.lt.s32.totalorder %s2659_s25, %s2659_s25 }
 0x616   :  { %p3722_p0 = scmp.ne.s32.totalorder %s2659_s25, %s3721_s27  ;;  %p3727_p2 = scmp.lt.s32.totalorder %s3721_s27, %s3721_s27 }
 0x618   :  { %p3728_p3 = por %p3727_p2, %p3726_p1 }
 0x61a   :  { %p3729_p4 = pnand %p3728_p3, %p3722_p0 }
 0x61c   :  { %3732 = shalt.err (!%p3729_p4)
}
 0x61d   :  { %s4210_s20 = sld [smem:[#allocation40_spill]] }
 0x623   :  { %s3733_s5 = scalar_lea.hbm %s4210_s20, 128 }
 0x624   :  { %p3734_p5 = scmp.ne.s32.totalorder %s4210_s20, %s3733_s5  ;;  %p3737_p6 = scmp.lt.u32.totalorder %s3733_s5, %s4210_s20 }
 0x626   :  { %p3739_p7 = pnand %p3737_p6, %p3734_p5 }
 0x628   :  { %3742 = shalt.err (!%p3739_p7)
}
 0x629   :  { %2661 = dma.vmem_to_hbm [thread:$0]  %s2659_s25, 128, %s4210_s20, [#allocation22]  }
 0x62a   :  { %3755 = dma.done.wait [#allocation4], 768  }
 0x62b   :  { %3756 = vsyncadd [#allocation4], 4294966528 }
 0x62c   :  { %3757 = dma.done.wait [#allocation22], 896  }
 0x62d   :  { %3758 = vsyncadd [#allocation22], 4294966400 }
 0x62e   :  { %3759 = dma.done.wait [#allocation25], 128  }
 0x62f   :  { %3760 = vsyncadd [#allocation25], 4294967168 }
 0x630   :  { %2684 = vsyncpa [#allocation3], 1 }
 0x631   :  { %2685 = vsyncpa [#allocation6], 1 }
 0x632   :  { %2686 = vsyncpa [#allocation9], 1 }
 0x633   :  { %2687 = vsyncpa [#allocation12], 1 }
 0x634   :  { %2688 = vsyncpa [#allocation15], 1 }
 0x635   :  { %2689 = vsyncpa [#allocation18], 1 }
 0x636   :  { %2690 = vsyncpa [#allocation4], 1 }
 0x637   :  { %2691 = vsyncpa [#allocation22], 1 }
 0x638   :  { %2692 = vsyncpa [#allocation25], 1 }

</bundles_post_ra>
